<compile_context>
chip_gen: v7x
topology: tpu7x:2x2x1
jax: 0.10.0
libtpu: 0.0.40
codegen_flags: <defaults>
</compile_context>

<pallas_src>
import numpy as np

import jax
import jax.numpy as jnp
from jax.experimental import pallas as pl
from jax.experimental.pallas import tpu as pltpu


# ------------------------------ helpers --------------------------------------
def _bilinear_matrix_np(n_in, n_out):
    """align_corners=True bilinear interpolation matrix M (n_out, n_in): out = M @ in."""
    if n_in == 1:
        return np.ones((n_out, 1), np.float32)
    src = np.arange(n_out, dtype=np.float64) * (n_in - 1) / (n_out - 1)
    lo = np.clip(np.floor(src).astype(np.int64), 0, n_in - 2)
    frac = (src - lo).astype(np.float32)
    m = np.zeros((n_out, n_in), np.float32)
    m[np.arange(n_out), lo] += 1.0 - frac
    m[np.arange(n_out), lo + 1] += frac
    return m


# ------------------------------ Pallas kernel ---------------------------------
def _make_kernel(nt, cin, cout, h2, w2):
    lanes = cin * w2

    def kernel(x_ref, bd_ref, mh_ref, wrow_ref, b_ref, o_ref):
        # x_ref   : (nt, H, Cin*W)       input images, channels packed on lanes
        # bd_ref  : (3, Cin*W, Cin*W2)   block-diag column-interp matrix per dw tap
        # mh_ref  : (3, H2, H)           row-interp matrix per dh tap
        # wrow_ref: (Cout*9, Cin*W2)     conv weights broadcast to lane-constant rows
        # b_ref   : (Cout,)  SMEM        conv bias
        # o_ref   : (nt, Cout, H2, Cin*W2)
        hi = jax.lax.Precision.HIGHEST
        for b in range(nt):
            x_b = x_ref[b]                                           # (H, Cin*W)
            accs = [jnp.zeros((h2, lanes), jnp.float32) for _ in range(cout)]
            for dw in range(3):
                # column interpolation + zero pad + dw shift, all channels at once
                y_dw = jnp.dot(x_b, bd_ref[dw], precision=hi,
                               preferred_element_type=jnp.float32)   # (H, 128)
                for dh in range(3):
                    # row interpolation + zero pad + dh shift -> aligned tap window
                    p = jnp.dot(mh_ref[dh], y_dw, precision=hi,
                                preferred_element_type=jnp.float32)  # (H2, 128)
                    for co in range(cout):
                        wt = wrow_ref[(co * 3 + dh) * 3 + dw, :]     # (128,) lane row
                        accs[co] = accs[co] + wt * p                 # full-lane VPU FMA
            for co in range(cout):
                a = accs[co]
                # reduce the Cin lane blocks: cyclic tree-reduction on the XLU
                shift = lanes // 2
                while shift >= w2:
                    a = a + pltpu.roll(a, shift=shift, axis=1)
                    shift //= 2
                # every W2-wide lane block now holds the full channel sum
                o_ref[b, co] = jnp.maximum(a + b_ref[co], 0.0).astype(o_ref.dtype)

    return kernel


# --------------------------- wrapper / pallas_call ----------------------------
@jax.jit
def upsample_forward(x_nchw, weight_oihw, bias):
    """UpSample.forward: bilinear 2x upsample (align_corners=True) -> 3x3 conv -> ReLU."""
    n, cin, h, w = x_nchw.shape
    cout = weight_oihw.shape[0]
    h2, w2 = 2 * h, 2 * w
    lanes = cin * w2
    assert cin > 0 and (cin & (cin - 1)) == 0, "lane-block reduction assumes power-of-two Cin"

    # ---- compile-time interpolation constants --------------------------------
    # Zero-padded interpolation matrices: the zero border rows/cols reproduce the
    # conv's 1-pixel zero padding, and the 3x3 tap shifts are folded in so that
    #   window U[ci,dh,dw] = MH[dh] @ x[ci] @ MWT[dw]   (no runtime slices).
    mh = _bilinear_matrix_np(h, h2)                                  # (H2, H)
    mw = _bilinear_matrix_np(w, w2)                                  # (W2, W)
    mh_pad = np.zeros((h2 + 2, h), np.float32); mh_pad[1:-1] = mh
    mw_pad = np.zeros((w2 + 2, w), np.float32); mw_pad[1:-1] = mw
    mh_stack = np.stack([mh_pad[dh:dh + h2] for dh in range(3)])     # (3, H2, H)
    bd = np.zeros((3, cin * w, lanes), np.float32)                   # block-diag col matrices
    for dw in range(3):
        mwt_dw = mw_pad[dw:dw + w2].T                                # (W, W2)
        for ci in range(cin):
            bd[dw, ci * w:(ci + 1) * w, ci * w2:(ci + 1) * w2] = mwt_dw

    # ---- tiny runtime weight prep (XLA, layout plumbing) ----------------------
    # lane-constant conv weight rows: wrow[co,dh,dw][ci*W2 + j] = W[co,ci,dh,dw]
    wrows = jnp.repeat(weight_oihw.astype(jnp.float32).transpose(0, 2, 3, 1),
                       w2, axis=-1).reshape(cout * 9, lanes)
    b_vec = bias.astype(jnp.float32)
    # channels packed along the lane axis: (N, H, Cin*W)
    x_t = x_nchw.astype(jnp.float32).transpose(0, 2, 1, 3).reshape(n, h, cin * w)

    # ---- grid: >=2 steps when N>=2 (balanced v7x TC split), <=8 images/step ---
    grid_len = min(n, max(2, pl.cdiv(n, 8)))
    nt = pl.cdiv(n, grid_len)
    n_padded = grid_len * nt
    if n_padded > n:
        x_t = jnp.concatenate(
            [x_t, jnp.zeros((n_padded - n, h, cin * w), jnp.float32)], axis=0)

    kernel = _make_kernel(nt, cin, cout, h2, w2)

    slab = pl.pallas_call(
        kernel,
        out_shape=jax.ShapeDtypeStruct((n_padded, cout, h2, lanes), jnp.float32),
        grid_spec=pltpu.PrefetchScalarGridSpec(
            num_scalar_prefetch=0,
            grid=(grid_len,),
            in_specs=[
                pl.BlockSpec((nt, h, cin * w), lambda i: (i, 0, 0)),
                # constant operands (constant index_map; double-buffering them wastes
                # only a few hundred KB of VMEM here, so we keep the default buffering)
                pl.BlockSpec((3, cin * w, lanes), lambda i: (0, 0, 0)),
                pl.BlockSpec((3, h2, h), lambda i: (0, 0, 0)),
                pl.BlockSpec((cout * 9, lanes), lambda i: (0, 0)),
                pl.BlockSpec(memory_space=pltpu.MemorySpace.SMEM),   # bias scalars
            ],
            out_specs=pl.BlockSpec((nt, cout, h2, lanes), lambda i: (i, 0, 0, 0)),
        ),
        compiler_params=pltpu.CompilerParams(
            dimension_semantics=("parallel",),   # v7x: split batch blocks across both TCs
        ),
    )(x_t, jnp.asarray(bd), jnp.asarray(mh_stack), wrows, b_vec)

    # lane-dense slab -> NCHW output: every W2-wide lane block holds the result,
    # take block 0.  Tiny XLA slice (layout plumbing only).
    return slab[:n, :, :, :w2].astype(x_nchw.dtype)


# ----------------------------- pure-JAX reference -----------------------------
def upsample_reference(x_nchw, weight_oihw, bias):
    _, _, h, w = x_nchw.shape
    mh = jnp.asarray(_bilinear_matrix_np(h, 2 * h))
    mw = jnp.asarray(_bilinear_matrix_np(w, 2 * w))
    up = jnp.einsum("nchw,Hh,Ww->ncHW", x_nchw, mh, mw,
                    precision=jax.lax.Precision.HIGHEST)
    y = jax.lax.conv_general_dilated(
        up, weight_oihw, window_strides=(1, 1), padding="SAME",
        dimension_numbers=("NCHW", "OIHW", "NCHW"),
        precision=jax.lax.Precision.HIGHEST)
    y = y + bias[None, :, None, None]
    return jnp.maximum(y, 0.0)


if __name__ == "__main__":
    # Module config: UpSample(in_channels=4, out_channels=8, bilinear=True, norm='none')
    # -> conv is Conv2d(4, mid=in_channels//2=2, k=3, pad=1) + ReLU (output channels = 2)
    in_channels = 4
    mid_channels = in_channels // 2

    key = jax.random.PRNGKey(0)
    kx, kw, kb = jax.random.split(key, 3)

    x = jax.random.normal(kx, (2, in_channels, 16, 16), dtype=jnp.float32)
    fan_in = in_channels * 3 * 3
    bound = 1.0 / (fan_in ** 0.5)
    weight = jax.random.uniform(kw, (mid_channels, in_channels, 3, 3),
                                minval=-bound, maxval=bound, dtype=jnp.float32)
    bias = jax.random.uniform(kb, (mid_channels,), minval=-bound, maxval=bound,
                              dtype=jnp.float32)

    out = jax.block_until_ready(upsample_forward(x, weight, bias))
    ref = upsample_reference(x, weight, bias)

    assert out.shape == (2, mid_channels, 32, 32), out.shape
    max_err = float(jnp.max(jnp.abs(out - ref)))
    assert jnp.allclose(out, ref, atol=1e-3, rtol=1e-3), max_err

    print("KERNEL_OK")
</pallas_src>

<mosaic_0001>
module attributes {stable_mosaic.version = 11 : i64} {
  func.func @kernel(%arg0: i32, %arg1: memref<1x16x64xf32, #tpu.memory_space<vmem>>, %arg2: memref<3x64x128xf32, #tpu.memory_space<vmem>>, %arg3: memref<3x32x16xf32, #tpu.memory_space<vmem>>, %arg4: memref<18x128xf32, #tpu.memory_space<vmem>>, %arg5: memref<2xf32, #tpu.memory_space<smem>>, %arg6: memref<1x2x32x128xf32, #tpu.memory_space<vmem>>) attributes {dimension_semantics = [#tpu.dimension_semantics<parallel>], iteration_bounds = array<i64: 2>, scalar_prefetch = 0 : i64, scratch_operands = 0 : i64, tpu.core_type = #tpu.core_type<tc>, window_params = [{transform_indices = @transform_0, window_bounds = array<i64: 1, 16, 64>}, {pipeline_mode = #tpu.pipeline_mode<synchronous>, transform_indices = @transform_1, window_bounds = array<i64: 3, 64, 128>}, {pipeline_mode = #tpu.pipeline_mode<synchronous>, transform_indices = @transform_2, window_bounds = array<i64: 3, 32, 16>}, {pipeline_mode = #tpu.pipeline_mode<synchronous>, transform_indices = @transform_3, window_bounds = array<i64: 18, 128>}, {transform_indices = @transform_4, window_bounds = array<i64: 2>}, {transform_indices = @transform_5, window_bounds = array<i64: 1, 2, 32, 128>}]} {
    %c0 = arith.constant 0 : index
    %c0_0 = arith.constant 0 : index
    %c0_1 = arith.constant 0 : index
    %0 = vector.load %arg1[%c0, %c0_0, %c0_1] : memref<1x16x64xf32, #tpu.memory_space<vmem>>, vector<1x16x64xf32>
    %1 = vector.shape_cast %0 : vector<1x16x64xf32> to vector<16x64xf32>
    %cst = arith.constant 0.000000e+00 : f32
    %2 = vector.broadcast %cst : f32 to vector<32x128xf32>
    %cst_2 = arith.constant 0.000000e+00 : f32
    %3 = vector.broadcast %cst_2 : f32 to vector<32x128xf32>
    %c0_3 = arith.constant 0 : index
    %c0_4 = arith.constant 0 : index
    %c0_5 = arith.constant 0 : index
    %4 = vector.load %arg2[%c0_3, %c0_4, %c0_5] : memref<3x64x128xf32, #tpu.memory_space<vmem>>, vector<1x64x128xf32>
    %5 = vector.shape_cast %4 : vector<1x64x128xf32> to vector<64x128xf32>
    %cst_6 = arith.constant dense<0.000000e+00> : vector<16x128xf32>
    %6 = tpu.matmul %1, %5, %cst_6 {dimension_numbers = #tpu.dot_dimension_numbers<[1], [0], [0], [1], [0, 0, 1, 1], [], []>, precision = #tpu.contract_precision<fp32>} : vector<16x64xf32>, vector<64x128xf32>, vector<16x128xf32> -> vector<16x128xf32>
    %c0_7 = arith.constant 0 : index
    %c0_8 = arith.constant 0 : index
    %c0_9 = arith.constant 0 : index
    %7 = vector.load %arg3[%c0_7, %c0_8, %c0_9] : memref<3x32x16xf32, #tpu.memory_space<vmem>>, vector<1x32x16xf32>
    %8 = vector.shape_cast %7 : vector<1x32x16xf32> to vector<32x16xf32>
    %cst_10 = arith.constant dense<0.000000e+00> : vector<32x128xf32>
    %9 = tpu.matmul %8, %6, %cst_10 {dimension_numbers = #tpu.dot_dimension_numbers<[1], [0], [0], [1], [0, 0, 1, 1], [], []>, precision = #tpu.contract_precision<fp32>} : vector<32x16xf32>, vector<16x128xf32>, vector<32x128xf32> -> vector<32x128xf32>
    %c0_11 = arith.constant 0 : index
    %c0_12 = arith.constant 0 : index
    %10 = vector.load %arg4[%c0_11, %c0_12] : memref<18x128xf32, #tpu.memory_space<vmem>>, vector<1x128xf32>
    %11 = vector.shape_cast %10 : vector<1x128xf32> to vector<128xf32>
    %12 = vector.shape_cast %11 : vector<128xf32> to vector<1x128xf32>
    %13 = vector.broadcast %12 : vector<1x128xf32> to vector<32x128xf32>
    %14 = arith.mulf %13, %9 : vector<32x128xf32>
    %15 = arith.addf %2, %14 : vector<32x128xf32>
    %c9 = arith.constant 9 : index
    %c0_13 = arith.constant 0 : index
    %16 = vector.load %arg4[%c9, %c0_13] : memref<18x128xf32, #tpu.memory_space<vmem>>, vector<1x128xf32>
    %17 = vector.shape_cast %16 : vector<1x128xf32> to vector<128xf32>
    %18 = vector.shape_cast %17 : vector<128xf32> to vector<1x128xf32>
    %19 = vector.broadcast %18 : vector<1x128xf32> to vector<32x128xf32>
    %20 = arith.mulf %19, %9 : vector<32x128xf32>
    %21 = arith.addf %3, %20 : vector<32x128xf32>
    %c1 = arith.constant 1 : index
    %c0_14 = arith.constant 0 : index
    %c0_15 = arith.constant 0 : index
    %22 = vector.load %arg3[%c1, %c0_14, %c0_15] : memref<3x32x16xf32, #tpu.memory_space<vmem>>, vector<1x32x16xf32>
    %23 = vector.shape_cast %22 : vector<1x32x16xf32> to vector<32x16xf32>
    %cst_16 = arith.constant dense<0.000000e+00> : vector<32x128xf32>
    %24 = tpu.matmul %23, %6, %cst_16 {dimension_numbers = #tpu.dot_dimension_numbers<[1], [0], [0], [1], [0, 0, 1, 1], [], []>, precision = #tpu.contract_precision<fp32>} : vector<32x16xf32>, vector<16x128xf32>, vector<32x128xf32> -> vector<32x128xf32>
    %c3 = arith.constant 3 : index
    %c0_17 = arith.constant 0 : index
    %25 = vector.load %arg4[%c3, %c0_17] : memref<18x128xf32, #tpu.memory_space<vmem>>, vector<1x128xf32>
    %26 = vector.shape_cast %25 : vector<1x128xf32> to vector<128xf32>
    %27 = vector.shape_cast %26 : vector<128xf32> to vector<1x128xf32>
    %28 = vector.broadcast %27 : vector<1x128xf32> to vector<32x128xf32>
    %29 = arith.mulf %28, %24 : vector<32x128xf32>
    %30 = arith.addf %15, %29 : vector<32x128xf32>
    %c12 = arith.constant 12 : index
    %c0_18 = arith.constant 0 : index
    %31 = vector.load %arg4[%c12, %c0_18] : memref<18x128xf32, #tpu.memory_space<vmem>>, vector<1x128xf32>
    %32 = vector.shape_cast %31 : vector<1x128xf32> to vector<128xf32>
    %33 = vector.shape_cast %32 : vector<128xf32> to vector<1x128xf32>
    %34 = vector.broadcast %33 : vector<1x128xf32> to vector<32x128xf32>
    %35 = arith.mulf %34, %24 : vector<32x128xf32>
    %36 = arith.addf %21, %35 : vector<32x128xf32>
    %c2 = arith.constant 2 : index
    %c0_19 = arith.constant 0 : index
    %c0_20 = arith.constant 0 : index
    %37 = vector.load %arg3[%c2, %c0_19, %c0_20] : memref<3x32x16xf32, #tpu.memory_space<vmem>>, vector<1x32x16xf32>
    %38 = vector.shape_cast %37 : vector<1x32x16xf32> to vector<32x16xf32>
    %cst_21 = arith.constant dense<0.000000e+00> : vector<32x128xf32>
    %39 = tpu.matmul %38, %6, %cst_21 {dimension_numbers = #tpu.dot_dimension_numbers<[1], [0], [0], [1], [0, 0, 1, 1], [], []>, precision = #tpu.contract_precision<fp32>} : vector<32x16xf32>, vector<16x128xf32>, vector<32x128xf32> -> vector<32x128xf32>
    %c6 = arith.constant 6 : index
    %c0_22 = arith.constant 0 : index
    %40 = vector.load %arg4[%c6, %c0_22] : memref<18x128xf32, #tpu.memory_space<vmem>>, vector<1x128xf32>
    %41 = vector.shape_cast %40 : vector<1x128xf32> to vector<128xf32>
    %42 = vector.shape_cast %41 : vector<128xf32> to vector<1x128xf32>
    %43 = vector.broadcast %42 : vector<1x128xf32> to vector<32x128xf32>
    %44 = arith.mulf %43, %39 : vector<32x128xf32>
    %45 = arith.addf %30, %44 : vector<32x128xf32>
    %c15 = arith.constant 15 : index
    %c0_23 = arith.constant 0 : index
    %46 = vector.load %arg4[%c15, %c0_23] : memref<18x128xf32, #tpu.memory_space<vmem>>, vector<1x128xf32>
    %47 = vector.shape_cast %46 : vector<1x128xf32> to vector<128xf32>
    %48 = vector.shape_cast %47 : vector<128xf32> to vector<1x128xf32>
    %49 = vector.broadcast %48 : vector<1x128xf32> to vector<32x128xf32>
    %50 = arith.mulf %49, %39 : vector<32x128xf32>
    %51 = arith.addf %36, %50 : vector<32x128xf32>
    %c1_24 = arith.constant 1 : index
    %c0_25 = arith.constant 0 : index
    %c0_26 = arith.constant 0 : index
    %52 = vector.load %arg2[%c1_24, %c0_25, %c0_26] : memref<3x64x128xf32, #tpu.memory_space<vmem>>, vector<1x64x128xf32>
    %53 = vector.shape_cast %52 : vector<1x64x128xf32> to vector<64x128xf32>
    %cst_27 = arith.constant dense<0.000000e+00> : vector<16x128xf32>
    %54 = tpu.matmul %1, %53, %cst_27 {dimension_numbers = #tpu.dot_dimension_numbers<[1], [0], [0], [1], [0, 0, 1, 1], [], []>, precision = #tpu.contract_precision<fp32>} : vector<16x64xf32>, vector<64x128xf32>, vector<16x128xf32> -> vector<16x128xf32>
    %c0_28 = arith.constant 0 : index
    %c0_29 = arith.constant 0 : index
    %c0_30 = arith.constant 0 : index
    %55 = vector.load %arg3[%c0_28, %c0_29, %c0_30] : memref<3x32x16xf32, #tpu.memory_space<vmem>>, vector<1x32x16xf32>
    %56 = vector.shape_cast %55 : vector<1x32x16xf32> to vector<32x16xf32>
    %cst_31 = arith.constant dense<0.000000e+00> : vector<32x128xf32>
    %57 = tpu.matmul %56, %54, %cst_31 {dimension_numbers = #tpu.dot_dimension_numbers<[1], [0], [0], [1], [0, 0, 1, 1], [], []>, precision = #tpu.contract_precision<fp32>} : vector<32x16xf32>, vector<16x128xf32>, vector<32x128xf32> -> vector<32x128xf32>
    %c1_32 = arith.constant 1 : index
    %c0_33 = arith.constant 0 : index
    %58 = vector.load %arg4[%c1_32, %c0_33] : memref<18x128xf32, #tpu.memory_space<vmem>>, vector<1x128xf32>
    %59 = vector.shape_cast %58 : vector<1x128xf32> to vector<128xf32>
    %60 = vector.shape_cast %59 : vector<128xf32> to vector<1x128xf32>
    %61 = vector.broadcast %60 : vector<1x128xf32> to vector<32x128xf32>
    %62 = arith.mulf %61, %57 : vector<32x128xf32>
    %63 = arith.addf %45, %62 : vector<32x128xf32>
    %c10 = arith.constant 10 : index
    %c0_34 = arith.constant 0 : index
    %64 = vector.load %arg4[%c10, %c0_34] : memref<18x128xf32, #tpu.memory_space<vmem>>, vector<1x128xf32>
    %65 = vector.shape_cast %64 : vector<1x128xf32> to vector<128xf32>
    %66 = vector.shape_cast %65 : vector<128xf32> to vector<1x128xf32>
    %67 = vector.broadcast %66 : vector<1x128xf32> to vector<32x128xf32>
    %68 = arith.mulf %67, %57 : vector<32x128xf32>
    %69 = arith.addf %51, %68 : vector<32x128xf32>
    %c1_35 = arith.constant 1 : index
    %c0_36 = arith.constant 0 : index
    %c0_37 = arith.constant 0 : index
    %70 = vector.load %arg3[%c1_35, %c0_36, %c0_37] : memref<3x32x16xf32, #tpu.memory_space<vmem>>, vector<1x32x16xf32>
    %71 = vector.shape_cast %70 : vector<1x32x16xf32> to vector<32x16xf32>
    %cst_38 = arith.constant dense<0.000000e+00> : vector<32x128xf32>
    %72 = tpu.matmul %71, %54, %cst_38 {dimension_numbers = #tpu.dot_dimension_numbers<[1], [0], [0], [1], [0, 0, 1, 1], [], []>, precision = #tpu.contract_precision<fp32>} : vector<32x16xf32>, vector<16x128xf32>, vector<32x128xf32> -> vector<32x128xf32>
    %c4 = arith.constant 4 : index
    %c0_39 = arith.constant 0 : index
    %73 = vector.load %arg4[%c4, %c0_39] : memref<18x128xf32, #tpu.memory_space<vmem>>, vector<1x128xf32>
    %74 = vector.shape_cast %73 : vector<1x128xf32> to vector<128xf32>
    %75 = vector.shape_cast %74 : vector<128xf32> to vector<1x128xf32>
    %76 = vector.broadcast %75 : vector<1x128xf32> to vector<32x128xf32>
    %77 = arith.mulf %76, %72 : vector<32x128xf32>
    %78 = arith.addf %63, %77 : vector<32x128xf32>
    %c13 = arith.constant 13 : index
    %c0_40 = arith.constant 0 : index
    %79 = vector.load %arg4[%c13, %c0_40] : memref<18x128xf32, #tpu.memory_space<vmem>>, vector<1x128xf32>
    %80 = vector.shape_cast %79 : vector<1x128xf32> to vector<128xf32>
    %81 = vector.shape_cast %80 : vector<128xf32> to vector<1x128xf32>
    %82 = vector.broadcast %81 : vector<1x128xf32> to vector<32x128xf32>
    %83 = arith.mulf %82, %72 : vector<32x128xf32>
    %84 = arith.addf %69, %83 : vector<32x128xf32>
    %c2_41 = arith.constant 2 : index
    %c0_42 = arith.constant 0 : index
    %c0_43 = arith.constant 0 : index
    %85 = vector.load %arg3[%c2_41, %c0_42, %c0_43] : memref<3x32x16xf32, #tpu.memory_space<vmem>>, vector<1x32x16xf32>
    %86 = vector.shape_cast %85 : vector<1x32x16xf32> to vector<32x16xf32>
    %cst_44 = arith.constant dense<0.000000e+00> : vector<32x128xf32>
    %87 = tpu.matmul %86, %54, %cst_44 {dimension_numbers = #tpu.dot_dimension_numbers<[1], [0], [0], [1], [0, 0, 1, 1], [], []>, precision = #tpu.contract_precision<fp32>} : vector<32x16xf32>, vector<16x128xf32>, vector<32x128xf32> -> vector<32x128xf32>
    %c7 = arith.constant 7 : index
    %c0_45 = arith.constant 0 : index
    %88 = vector.load %arg4[%c7, %c0_45] : memref<18x128xf32, #tpu.memory_space<vmem>>, vector<1x128xf32>
    %89 = vector.shape_cast %88 : vector<1x128xf32> to vector<128xf32>
    %90 = vector.shape_cast %89 : vector<128xf32> to vector<1x128xf32>
    %91 = vector.broadcast %90 : vector<1x128xf32> to vector<32x128xf32>
    %92 = arith.mulf %91, %87 : vector<32x128xf32>
    %93 = arith.addf %78, %92 : vector<32x128xf32>
    %c16 = arith.constant 16 : index
    %c0_46 = arith.constant 0 : index
    %94 = vector.load %arg4[%c16, %c0_46] : memref<18x128xf32, #tpu.memory_space<vmem>>, vector<1x128xf32>
    %95 = vector.shape_cast %94 : vector<1x128xf32> to vector<128xf32>
    %96 = vector.shape_cast %95 : vector<128xf32> to vector<1x128xf32>
    %97 = vector.broadcast %96 : vector<1x128xf32> to vector<32x128xf32>
    %98 = arith.mulf %97, %87 : vector<32x128xf32>
    %99 = arith.addf %84, %98 : vector<32x128xf32>
    %c2_47 = arith.constant 2 : index
    %c0_48 = arith.constant 0 : index
    %c0_49 = arith.constant 0 : index
    %100 = vector.load %arg2[%c2_47, %c0_48, %c0_49] : memref<3x64x128xf32, #tpu.memory_space<vmem>>, vector<1x64x128xf32>
    %101 = vector.shape_cast %100 : vector<1x64x128xf32> to vector<64x128xf32>
    %cst_50 = arith.constant dense<0.000000e+00> : vector<16x128xf32>
    %102 = tpu.matmul %1, %101, %cst_50 {dimension_numbers = #tpu.dot_dimension_numbers<[1], [0], [0], [1], [0, 0, 1, 1], [], []>, precision = #tpu.contract_precision<fp32>} : vector<16x64xf32>, vector<64x128xf32>, vector<16x128xf32> -> vector<16x128xf32>
    %c0_51 = arith.constant 0 : index
    %c0_52 = arith.constant 0 : index
    %c0_53 = arith.constant 0 : index
    %103 = vector.load %arg3[%c0_51, %c0_52, %c0_53] : memref<3x32x16xf32, #tpu.memory_space<vmem>>, vector<1x32x16xf32>
    %104 = vector.shape_cast %103 : vector<1x32x16xf32> to vector<32x16xf32>
    %cst_54 = arith.constant dense<0.000000e+00> : vector<32x128xf32>
    %105 = tpu.matmul %104, %102, %cst_54 {dimension_numbers = #tpu.dot_dimension_numbers<[1], [0], [0], [1], [0, 0, 1, 1], [], []>, precision = #tpu.contract_precision<fp32>} : vector<32x16xf32>, vector<16x128xf32>, vector<32x128xf32> -> vector<32x128xf32>
    %c2_55 = arith.constant 2 : index
    %c0_56 = arith.constant 0 : index
    %106 = vector.load %arg4[%c2_55, %c0_56] : memref<18x128xf32, #tpu.memory_space<vmem>>, vector<1x128xf32>
    %107 = vector.shape_cast %106 : vector<1x128xf32> to vector<128xf32>
    %108 = vector.shape_cast %107 : vector<128xf32> to vector<1x128xf32>
    %109 = vector.broadcast %108 : vector<1x128xf32> to vector<32x128xf32>
    %110 = arith.mulf %109, %105 : vector<32x128xf32>
    %111 = arith.addf %93, %110 : vector<32x128xf32>
    %c11 = arith.constant 11 : index
    %c0_57 = arith.constant 0 : index
    %112 = vector.load %arg4[%c11, %c0_57] : memref<18x128xf32, #tpu.memory_space<vmem>>, vector<1x128xf32>
    %113 = vector.shape_cast %112 : vector<1x128xf32> to vector<128xf32>
    %114 = vector.shape_cast %113 : vector<128xf32> to vector<1x128xf32>
    %115 = vector.broadcast %114 : vector<1x128xf32> to vector<32x128xf32>
    %116 = arith.mulf %115, %105 : vector<32x128xf32>
    %117 = arith.addf %99, %116 : vector<32x128xf32>
    %c1_58 = arith.constant 1 : index
    %c0_59 = arith.constant 0 : index
    %c0_60 = arith.constant 0 : index
    %118 = vector.load %arg3[%c1_58, %c0_59, %c0_60] : memref<3x32x16xf32, #tpu.memory_space<vmem>>, vector<1x32x16xf32>
    %119 = vector.shape_cast %118 : vector<1x32x16xf32> to vector<32x16xf32>
    %cst_61 = arith.constant dense<0.000000e+00> : vector<32x128xf32>
    %120 = tpu.matmul %119, %102, %cst_61 {dimension_numbers = #tpu.dot_dimension_numbers<[1], [0], [0], [1], [0, 0, 1, 1], [], []>, precision = #tpu.contract_precision<fp32>} : vector<32x16xf32>, vector<16x128xf32>, vector<32x128xf32> -> vector<32x128xf32>
    %c5 = arith.constant 5 : index
    %c0_62 = arith.constant 0 : index
    %121 = vector.load %arg4[%c5, %c0_62] : memref<18x128xf32, #tpu.memory_space<vmem>>, vector<1x128xf32>
    %122 = vector.shape_cast %121 : vector<1x128xf32> to vector<128xf32>
    %123 = vector.shape_cast %122 : vector<128xf32> to vector<1x128xf32>
    %124 = vector.broadcast %123 : vector<1x128xf32> to vector<32x128xf32>
    %125 = arith.mulf %124, %120 : vector<32x128xf32>
    %126 = arith.addf %111, %125 : vector<32x128xf32>
    %c14 = arith.constant 14 : index
    %c0_63 = arith.constant 0 : index
    %127 = vector.load %arg4[%c14, %c0_63] : memref<18x128xf32, #tpu.memory_space<vmem>>, vector<1x128xf32>
    %128 = vector.shape_cast %127 : vector<1x128xf32> to vector<128xf32>
    %129 = vector.shape_cast %128 : vector<128xf32> to vector<1x128xf32>
    %130 = vector.broadcast %129 : vector<1x128xf32> to vector<32x128xf32>
    %131 = arith.mulf %130, %120 : vector<32x128xf32>
    %132 = arith.addf %117, %131 : vector<32x128xf32>
    %c2_64 = arith.constant 2 : index
    %c0_65 = arith.constant 0 : index
    %c0_66 = arith.constant 0 : index
    %133 = vector.load %arg3[%c2_64, %c0_65, %c0_66] : memref<3x32x16xf32, #tpu.memory_space<vmem>>, vector<1x32x16xf32>
    %134 = vector.shape_cast %133 : vector<1x32x16xf32> to vector<32x16xf32>
    %cst_67 = arith.constant dense<0.000000e+00> : vector<32x128xf32>
    %135 = tpu.matmul %134, %102, %cst_67 {dimension_numbers = #tpu.dot_dimension_numbers<[1], [0], [0], [1], [0, 0, 1, 1], [], []>, precision = #tpu.contract_precision<fp32>} : vector<32x16xf32>, vector<16x128xf32>, vector<32x128xf32> -> vector<32x128xf32>
    %c8 = arith.constant 8 : index
    %c0_68 = arith.constant 0 : index
    %136 = vector.load %arg4[%c8, %c0_68] : memref<18x128xf32, #tpu.memory_space<vmem>>, vector<1x128xf32>
    %137 = vector.shape_cast %136 : vector<1x128xf32> to vector<128xf32>
    %138 = vector.shape_cast %137 : vector<128xf32> to vector<1x128xf32>
    %139 = vector.broadcast %138 : vector<1x128xf32> to vector<32x128xf32>
    %140 = arith.mulf %139, %135 : vector<32x128xf32>
    %141 = arith.addf %126, %140 : vector<32x128xf32>
    %c17 = arith.constant 17 : index
    %c0_69 = arith.constant 0 : index
    %142 = vector.load %arg4[%c17, %c0_69] : memref<18x128xf32, #tpu.memory_space<vmem>>, vector<1x128xf32>
    %143 = vector.shape_cast %142 : vector<1x128xf32> to vector<128xf32>
    %144 = vector.shape_cast %143 : vector<128xf32> to vector<1x128xf32>
    %145 = vector.broadcast %144 : vector<1x128xf32> to vector<32x128xf32>
    %146 = arith.mulf %145, %135 : vector<32x128xf32>
    %147 = arith.addf %132, %146 : vector<32x128xf32>
    %c64_i32 = arith.constant 64 : i32
    %148 = tpu.dynamic_rotate %141 by %c64_i32 dim 1 : vector<32x128xf32>, i32 -> vector<32x128xf32>
    %149 = arith.addf %141, %148 : vector<32x128xf32>
    %c32_i32 = arith.constant 32 : i32
    %150 = tpu.dynamic_rotate %149 by %c32_i32 dim 1 : vector<32x128xf32>, i32 -> vector<32x128xf32>
    %151 = arith.addf %149, %150 : vector<32x128xf32>
    %c0_70 = arith.constant 0 : index
    %152 = memref.load %arg5[%c0_70] : memref<2xf32, #tpu.memory_space<smem>>
    %153 = vector.broadcast %152 : f32 to vector<32x128xf32>
    %154 = arith.addf %151, %153 : vector<32x128xf32>
    %cst_71 = arith.constant 0.000000e+00 : f32
    %155 = vector.broadcast %cst_71 : f32 to vector<32x128xf32>
    %156 = arith.maximumf %154, %155 : vector<32x128xf32>
    %c0_72 = arith.constant 0 : index
    %c0_73 = arith.constant 0 : index
    %c0_74 = arith.constant 0 : index
    %c0_75 = arith.constant 0 : index
    %157 = vector.load %arg6[%c0_72, %c0_73, %c0_74, %c0_75] : memref<1x2x32x128xf32, #tpu.memory_space<vmem>>, vector<1x1x32x128xf32>
    %158 = vector.shape_cast %157 : vector<1x1x32x128xf32> to vector<32x128xf32>
    %159 = vector.shape_cast %156 : vector<32x128xf32> to vector<1x1x32x128xf32>
    tpu.vector_store %arg6[%c0_72, %c0_73, %c0_74, %c0_75], %159 {strides = array<i32>} : memref<1x2x32x128xf32, #tpu.memory_space<vmem>>, vector<1x1x32x128xf32>,
    %c64_i32_76 = arith.constant 64 : i32
    %160 = tpu.dynamic_rotate %147 by %c64_i32_76 dim 1 : vector<32x128xf32>, i32 -> vector<32x128xf32>
    %161 = arith.addf %147, %160 : vector<32x128xf32>
    %c32_i32_77 = arith.constant 32 : i32
    %162 = tpu.dynamic_rotate %161 by %c32_i32_77 dim 1 : vector<32x128xf32>, i32 -> vector<32x128xf32>
    %163 = arith.addf %161, %162 : vector<32x128xf32>
    %c1_78 = arith.constant 1 : index
    %164 = memref.load %arg5[%c1_78] : memref<2xf32, #tpu.memory_space<smem>>
    %165 = vector.broadcast %164 : f32 to vector<32x128xf32>
    %166 = arith.addf %163, %165 : vector<32x128xf32>
    %cst_79 = arith.constant 0.000000e+00 : f32
    %167 = vector.broadcast %cst_79 : f32 to vector<32x128xf32>
    %168 = arith.maximumf %166, %167 : vector<32x128xf32>
    %c0_80 = arith.constant 0 : index
    %c1_81 = arith.constant 1 : index
    %c0_82 = arith.constant 0 : index
    %c0_83 = arith.constant 0 : index
    %169 = vector.load %arg6[%c0_80, %c1_81, %c0_82, %c0_83] : memref<1x2x32x128xf32, #tpu.memory_space<vmem>>, vector<1x1x32x128xf32>
    %170 = vector.shape_cast %169 : vector<1x1x32x128xf32> to vector<32x128xf32>
    %171 = vector.shape_cast %168 : vector<32x128xf32> to vector<1x1x32x128xf32>
    tpu.vector_store %arg6[%c0_80, %c1_81, %c0_82, %c0_83], %171 {strides = array<i32>} : memref<1x2x32x128xf32, #tpu.memory_space<vmem>>, vector<1x1x32x128xf32>,
    return
  }
  func.func @transform_0(%arg0: i32) -> (i32, i32, i32) {
    %c0_i32 = arith.constant 0 : i32
    %c0_i32_0 = arith.constant 0 : i32
    %c0_i32_1 = arith.constant 0 : i32
    return %arg0, %c0_i32, %c0_i32_0 : i32, i32, i32
  }
  func.func @transform_1(%arg0: i32) -> (i32, i32, i32) {
    %c0_i32 = arith.constant 0 : i32
    %c0_i32_0 = arith.constant 0 : i32
    %c0_i32_1 = arith.constant 0 : i32
    %c0_i32_2 = arith.constant 0 : i32
    return %c0_i32, %c0_i32_0, %c0_i32_1 : i32, i32, i32
  }
  func.func @transform_2(%arg0: i32) -> (i32, i32, i32) {
    %c0_i32 = arith.constant 0 : i32
    %c0_i32_0 = arith.constant 0 : i32
    %c0_i32_1 = arith.constant 0 : i32
    %c0_i32_2 = arith.constant 0 : i32
    return %c0_i32, %c0_i32_0, %c0_i32_1 : i32, i32, i32
  }
  func.func @transform_3(%arg0: i32) -> (i32, i32) {
    %c0_i32 = arith.constant 0 : i32
    %c0_i32_0 = arith.constant 0 : i32
    %c0_i32_1 = arith.constant 0 : i32
    return %c0_i32, %c0_i32_0 : i32, i32
  }
  func.func @transform_4(%arg0: i32) -> i32 {
    %c0_i32 = arith.constant 0 : i32
    %c0_i32_0 = arith.constant 0 : i32
    return %c0_i32 : i32
  }
  func.func @transform_5(%arg0: i32) -> (i32, i32, i32, i32) {
    %c0_i32 = arith.constant 0 : i32
    %c0_i32_0 = arith.constant 0 : i32
    %c0_i32_1 = arith.constant 0 : i32
    %c0_i32_2 = arith.constant 0 : i32
    return %arg0, %c0_i32, %c0_i32_0, %c0_i32_1 : i32, i32, i32, i32
  }
}

</mosaic_0001>

<bundles_post_ra>
// kernel: upsample_forward.1
= control target key start
LH: loop header
LB: loop body
LE: loop exit
PB: predicated region body
PF: predicated region fallthrough
CT: control target
= control target key end

     0   :  { %10 = vsyncpa [#allocation4], 0  ;;  %s11306_s0 = inlined_call_operand.vmem [shape: f32[2,16,64], index: 0, kind: input, shape index: {}]   ;;  %s11307_s1 = inlined_call_operand.vmem [shape: f32[3,64,128], index: 1, kind: input, shape index: {}]   ;;  %s11308_s2 = inlined_call_operand.vmem [shape: f32[3,32,16], index: 2, kind: input, shape index: {}]   ;;  %s11309_s3 = inlined_call_operand.vmem [shape: f32[18,128], index: 3, kind: input, shape index: {}]   ;;  %s11310_s4 = inlined_call_operand.vmem [shape: f32[2], index: 4, kind: input, shape index: {}]   ;;  %s11311_s5 = inlined_call_operand.hbm [shape: f32[2,2,32,128], index: 5, kind: output, shape index: {}]  }
   0x1   :  { %11 = vsyncpa [#allocation3], 0 }
   0x2   :  { %13 = vsyncpa [#allocation3 + $0x1], 0  ;;  %s10090_s18 = smov 0   ;;  %s10092_s19 = smov 0  }
   0x3   :  { %s10094_s20 = smov 0   ;;  %s10096_s21 = smov 0  }
   0x4 LB: > { %s10111_s22 = sadd.s32 4294967295, %s10052_s21   ;;  %s7754_s23 = sadd.s32 4294967294, %s10052_s21   ;;  %s10052_s21 = sphi %s10096_s21, %s11507_s21   ;;  %s10048_s20 = sphi %s10094_s20, %s11506_s20   ;;  %s10044_s19 = sphi %s10092_s19, %s11505_s19   ;;  %s10040_s18 = sphi %s10090_s18, %s11504_s18  }
   0x5   : > { %s10115_s24 = sadd.s32 1, %s10052_s21   ;;  %s136_s25 = sadd.s32 1, %s10048_s20 }
   0x6   : > { %s133_s26 = ssub.s32 %s10052_s21, %s10115_s24  ;;  %p146_p0 = scmp.ne.s32.totalorder %s10048_s20, %s10044_s19 }
   0x7   : > { %p134_p1 = scmp.eq.s32.totalorder %s133_s26, 0  ;;  %p147_p2 = scmp.eq.s32.totalorder %s10111_s22, 1 }
   0x8   : > { %p152_p3 = scmp.ne.s32.totalorder %s10044_s19, %s10040_s18  ;;  %p153_p4 = scmp.eq.s32.totalorder %s7754_s23, 1 }
   0x9   : > { %s10126_s27 = scalar_select %p134_p1, %s10048_s20, %s136_s25  }
   0xa   : > { %p10128_p5 = por %p147_p2, %p146_p0  ;;  %p10132_p6 = por %p153_p4, %p152_p3 }
   0xb   : > { %p7755_p7 = scmp.ge.s32.totalorder %s10052_s21, 1  ;;  %p160_p8 = scmp.lt.s32.totalorder %s10052_s21, 3 }
   0xc   : > { %p9931_p9 = scmp.eq.s32.totalorder %s10111_s22, 0  ;;  %s182_s8 = sshll.u32 %s11310_s4, 4  ;;  %s183_s8 = int_to_ptr.vmem [resolvable:$true] %s182_s8 }
   0xd   : > { %p10139_p10 = pnand %p7755_p7, %p160_p8  ;;  %s9971_s9 = scalar_lea.vmem %s183_s8, 16 }
   0xe   : > { %p9972_p13 = scmp.ne.s32.totalorder %s183_s8, %s9971_s9  ;;  %p9979_p3 = scmp.lt.s32.totalorder %s183_s8, %s183_s8 }
   0xf   : > { %p9923_p11 = pneg %p10139_p10  ;;  %p9980_p4 = scmp.lt.s32.totalorder %s9971_s9, %s9971_s9 }
  0x11   : > { %p9924_p12 = pnand %p9931_p9, %p9923_p11  ;;  %p9981_p7 = por %p9980_p4, %p9979_p3 }
  0x13   : > { %p9973_p0 = pneg %p9924_p12 }
  0x15   : > { %p9974_p1 = pnand %p9973_p0, %p9972_p13 }
  0x17   : > { %p9975_p2 = pneg %p9974_p1 }
  0x19   : > { %p9982_p8 = pnand %p9981_p7, %p9975_p2 }
  0x1b   : > { %9985 = shalt.err (!%p9982_p8)
}
  0x1c   : > { %s10054_s10 = smov [#allocation2]   ;;  %203 = sbr.rel (%p10139_p10) target bundleno = 1685 (0x695), region = 40 }
  0x1d   : > { %9926 = dma.vmem_to_smem (!%p9924_p12), %s183_s8, 16, %s10054_s10, [#allocation4]  }
  0x23   : > { %10031 = dma.done.wait (%p9931_p9), [#allocation4], 16  }
  0x24   : > { %10033 = vsyncadd (%p9931_p9), [#allocation4], 4294967280 }
  0x25   : > { %209 = sfence }
  0x26   : > { %v239_v0 = vld [vmem:[%s11307_s1] sm:$0xff]  ;;  %v240_v1 = vld [vmem:[%s11307_s1 + $0x8] sm:$0xff]  ;;  %v241_v2 = vld [vmem:[%s11307_s1 + $0x10] sm:$0xff]  ;;  %p232_p10 = scmp.lt.s32.totalorder %s10111_s22, 1  ;;  %vm247_vm0 = vcmask 523264   ;;  %vm838_vm1 = vcmask 130048  }
  0x27   : > { %v255_v3 = vand.u32 4294901760, %v239_v0  ;;  %v258_v4 = vand.u32 4294901760, %v240_v1  ;;  %v242_v5 = vld [vmem:[%s11307_s1 + $0x18] sm:$0xff]  ;;  %v261_v6 = vand.u32 4294901760, %v241_v2  ;;  %v243_v7 = vld [vmem:[%s11307_s1 + $0x20] sm:$0xff]  ;;  %v244_v8 = vld [vmem:[%s11307_s1 + $0x28] sm:$0xff] }
  0x28   : > { %v264_v9 = vand.u32 4294901760, %v242_v5  ;;  %v267_v10 = vand.u32 4294901760, %v243_v7  ;;  %v270_v11 = vand.u32 4294901760, %v244_v8  ;;  %v245_v12 = vld [vmem:[%s11307_s1 + $0x30] sm:$0xff]  ;;  %v246_v13 = vld [vmem:[%s11307_s1 + $0x38] sm:$0xff]  ;;  %s233_s11 = scalar_select %p232_p10, %s10111_s22, 1 }
  0x29   : > { %v10182_v14 = vpack.c.bf16 %v258_v4, %v255_v3  ;;  %v10184_v15 = vsub.f32 %v239_v0, %v255_v3  ;;  %v273_v17 = vand.u32 4294901760, %v245_v12  ;;  %v10188_v18 = vsub.f32 %v240_v1, %v258_v4  ;;  %s10056_s13 = smov 32   ;;  %s7613_s14 = sld [smem:[#allocation2]] }
  0x2a   : > { %v10186_v16 = vpack.c.bf16 %v264_v9, %v261_v6  ;;  %s7815_s12 = sshll.u32 %s233_s11, 4  ;;  %v10190_v19 = vsub.f32 %v241_v2, %v261_v6  ;;  %v10193_v20 = vpack.c.bf16 %v270_v11, %v267_v10  ;;  %v276_v21 = vand.u32 4294901760, %v246_v13  ;;  %s229_s16 = sand.u32 1, %s10044_s19  }
  0x2b   : > { %9204 = vmatprep.subr.bf16.mxu0 %v10182_v14  ;;  %s236_s15 = scalar_lea.vmem %s11306_s0, %s7815_s12  ;;  %v350_v22 = vand.u32 4294901760, %v10184_v15  ;;  %v10199_v23 = vsub.f32 %v242_v5, %v264_v9  ;;  %v357_v25 = vand.u32 4294901760, %v10188_v18  ;;  %v10204_v28 = vsub.f32 %v243_v7, %v267_v10  ;;  %s10055_s12 = smov 64  }
  0x2c   : > { %9206 = vmatpush3.bf16.msra.mxu0 %v10182_v14  ;;  %v237_v24 = vld [vmem:[%s236_s15] sm:$0xff]  ;;  %v238_v26 = vld [vmem:[%s236_s15 + $0x8] sm:$0xff]  ;;  %v364_v27 = vand.u32 4294901760, %v10190_v19  ;;  %v10206_v29 = vsub.f32 %v244_v8, %v270_v11  ;;  %v10222_v37 = vpack.c.bf16 %v276_v21, %v273_v17  ;;  %v10240_v46 = vsub.f32 %v245_v12, %v273_v17  ;;  %s7805_s15 = sld [smem:[#allocation2 + $0x1]]  ;;  %s7760_s17 = sshll.u32 %s229_s16, 6 }
  0x2d   : > { %9208 = vmatprep.subr.bf16.mxu0 %v10186_v16  ;;  %v249_v30 = vsel %vm247_vm0, %v237_v24, 0  ;;  %v351_v31 = vsub.f32 %v10184_v15, %v350_v22  ;;  %v252_v32 = vsel %vm247_vm0, %v238_v26, 0  ;;  %v371_v33 = vand.u32 4294901760, %v10199_v23  ;;  %v837_v24 = vld [vmem:[%s11308_s2 + $0x18] sm:$0xff]  ;;  %s11244_s23 = scalar_lea.vmem [#allocation5], %s7760_s17  ;;  %s7816_s25 = sshll.u32 %s10111_s22, 10 }
  0x2e   : > { %v10215_v34 = vand.u32 4294901760, %v249_v30  ;;  %v358_v35 = vsub.f32 %v10188_v18, %v357_v25  ;;  %v10220_v36 = vand.u32 4294901760, %v252_v32  ;;  %v365_v38 = vsub.f32 %v10190_v19, %v364_v27  ;;  %s7680_s26 = sshll.u32 %s11244_s23, 4  ;;  %s11258_s7 = scalar_lea.hbm %s11311_s5, %s7816_s25  ;;  %s11260_s26 = int_to_ptr.vmem [resolvable:$true] %s7680_s26 }
  0x2f   : > { %v372_v41 = vsub.f32 %v10199_v23, %v371_v33  ;;  %v378_v42 = vand.u32 4294901760, %v10204_v28  ;;  %v352_v43 = vand.u32 4294901760, %v351_v31  ;;  %v385_v45 = vand.u32 4294901760, %v10206_v29  ;;  %s11265_s8 = scalar_lea.sflag [#allocation3], %s229_s16  ;;  %s9986_s22 = scalar_lea.vmem %s11260_s26, 1024 }
  0x30   : > { %11398 = vst [vmem:[#allocation8_spill] sm:$0xff] %v10215_v34  ;;  %11399 = vst [vmem:[#allocation9_spill] sm:$0xff] %v10220_v36  ;;  %9210 = vmatpush3.bf16.msra.mxu0 %v10186_v16  ;;  %v10229_v39 = vsub.f32 %v249_v30, %v10215_v34  ;;  %v10232_v40 = vsub.f32 %v252_v32, %v10220_v36  ;;  %v359_v44 = vand.u32 4294901760, %v358_v35  ;;  %v366_v50 = vand.u32 4294901760, %v365_v38  ;;  %v7772_v30 = vld [vmem:[%s11308_s2 + $0x48] sm:$0xff]  ;;  %v7773_v38 = vld [vmem:[%s11308_s2 + $0x50] sm:$0xff]  ;;  %p9987_p9 = scmp.ne.s32.totalorder %s11260_s26, %s9986_s22 }
  0x31   : > { %9212 = vmatprep.subr.bf16.mxu0 %v10193_v20  ;;  %v10248_v49 = vsub.f32 %v246_v13, %v276_v21  ;;  %v373_v53 = vand.u32 4294901760, %v372_v41  ;;  %v379_v54 = vsub.f32 %v10204_v28, %v378_v42  ;;  %v386_v56 = vsub.f32 %v10206_v29, %v385_v45  ;;  %v835_v21 = vld [vmem:[%s11308_s2 + $0x8] sm:$0xff]  ;;  %s10057_s9 = smov [#allocation5]  }
  0x32   : > { %11400 = vst [vmem:[#allocation10_spill] sm:$0xff] %v10229_v39  ;;  %11401 = vst [vmem:[#allocation11_spill] sm:$0xff] %v10232_v40  ;;  %v10243_v47 = vand.u32 4294901760, %v10229_v39  ;;  %v10246_v48 = vand.u32 4294901760, %v10232_v40  ;;  %v9219_v55 = vpack.c.bf16 %v359_v44, %v352_v43  ;;  %v392_v57 = vand.u32 4294901760, %v10240_v46  ;;  %p9988_p11 = pnand %p9987_p9, %p10128_p5  ;;  %s9990_s10 = sshll.u32 %s10057_s9, 4  ;;  %s9991_s10 = int_to_ptr.vmem [resolvable:$false] %s9990_s10 }
  0x33   : > { %v399_v58 = vand.u32 4294901760, %v10248_v49  ;;  %v9223_v61 = vpack.c.bf16 %v373_v53, %v366_v50  ;;  %v380_v62 = vand.u32 4294901760, %v379_v54  ;;  %v387_v63 = vand.u32 4294901760, %v386_v56  ;;  %s9992_s11 = scalar_lea.vmem %s9991_s10, 2048  ;;  %p9993_p13 = scmp.lt.s32.totalorder %s11260_s26, %s9991_s10 }
  0x34   : > { %11402 = vst [vmem:[#allocation12_spill] sm:$0xff] %v10243_v47  ;;  %11403 = vst [vmem:[#allocation13_spill] sm:$0xff] %v10246_v48  ;;  %9214 = vmatpush3.bf16.msra.mxu0 %v10193_v20  ;;  %v330_v51 = vsub.f32 %v10229_v39, %v10243_v47  ;;  %v340_v52 = vsub.f32 %v10232_v40, %v10246_v48  ;;  %v393_v0 = vsub.f32 %v10240_v46, %v392_v57  ;;  %p9989_p12 = pneg %p9988_p11  ;;  %p9994_p0 = scmp.lt.s32.totalorder %s9992_s11, %s9986_s22 }
  0x35   : > { %9216 = vmatprep.subr.bf16.mxu0 %v10222_v37  ;;  %v400_v1 = vsub.f32 %v10248_v49, %v399_v58  ;;  %v9227_v2 = vpack.c.bf16 %v387_v63, %v380_v62  ;;  %v9235_v6 = vpack.c.bf16 %v10188_v18, %v10184_v15  ;;  %v9239_v7 = vpack.c.bf16 %v10199_v23, %v10190_v19 }
  0x36   : > { %v10264_v59 = vand.u32 4294901760, %v330_v51  ;;  %v10266_v60 = vand.u32 4294901760, %v340_v52  ;;  %v394_v3 = vand.u32 4294901760, %v393_v0  ;;  %v9243_v8 = vpack.c.bf16 %v10206_v29, %v10204_v28  ;;  %v7771_v28 = vld [vmem:[%s11308_s2 + $0x40] sm:$0xff]  ;;  %p9995_p1 = por %p9994_p0, %p9993_p13 }
  0x37   : > { %v401_v4 = vand.u32 4294901760, %v400_v1  ;;  %v9247_v9 = vpack.c.bf16 %v10248_v49, %v10240_v46  ;;  %v9267_v10 = vpack.c.bf16 %v357_v25, %v350_v22  ;;  %v9271_v11 = vpack.c.bf16 %v371_v33, %v364_v27  ;;  %v836_v22 = vld [vmem:[%s11308_s2 + $0x10] sm:$0xff] }
  0x38   : > { %11404 = vst [vmem:[#allocation14_spill] sm:$0xff] %v10264_v59  ;;  %11405 = vst [vmem:[#allocation15_spill] sm:$0xff] %v10266_v60  ;;  %9218 = vmatpush3.bf16.msra.mxu0 %v10222_v37  ;;  %8337 = vmatprep.mubr.f32.mxu0 %v10264_v59  ;;  %v9275_v12 = vpack.c.bf16 %v385_v45, %v378_v42  ;;  %v9279_v13 = vpack.c.bf16 %v399_v58, %v392_v57  ;;  %v843_v23 = vsel %vm838_vm1, %v835_v21, 0  ;;  %v7774_v42 = vld [vmem:[%s11308_s2 + $0x58] sm:$0xff]  ;;  %p9996_p2 = pnand %p9995_p1, %p9989_p12 }
  0x39   : > { %9220 = vmatprep.subr.bf16.mxu0 %v9219_v55  ;;  %v9231_v5 = vpack.c.bf16 %v401_v4, %v394_v3  ;;  %v846_v25 = vsel %vm838_vm1, %v836_v22, 0  ;;  %v10348_v26 = vand.u32 4294901760, %v843_v23  ;;  %v849_v27 = vsel %vm838_vm1, %v837_v24, 0 }
  0x3a   : > { %v10354_v29 = vand.u32 4294901760, %v846_v25  ;;  %v10362_v32 = vand.u32 4294901760, %v849_v27  ;;  %v2102_v33 = vsel %vm838_vm1, %v7771_v28, 0  ;;  %v2108_v46 = vsel %vm838_vm1, %v7773_v38, 0 }
  0x3b   : > { %8338 = vmatmul.mubr.f32.vlgmr.msra.gmra.mrb[0].mxu0 %v10266_v60  ;;  %v10360_v31 = vsub.f32 %v843_v23, %v10348_v26  ;;  %v10372_v41 = vand.u32 4294901760, %v2102_v33  ;;  %v2111_v50 = vsel %vm838_vm1, %v7774_v42, 0  ;;  %v10398_v57 = vand.u32 4294901760, %v2108_v46 }
  0x3c   : > { %9222 = vmatpush3.bf16.msra.mxu0 %v9219_v55  ;;  %8356 = vmatprep.mubr.f32.mxu0 %v10215_v34  ;;  %v10366_v35 = vsub.f32 %v846_v25, %v10354_v29  ;;  %v10381_v44 = vsub.f32 %v849_v27, %v10362_v32  ;;  %v10403_v62 = vand.u32 4294901760, %v2111_v50 }
  0x3d   : > { %9224 = vmatprep.subr.bf16.mxu0 %v9223_v61  ;;  %11407 = vst [vmem:[#allocation17_spill] sm:$0xff] %v10372_v41  ;;  %v10378_v43 = vand.u32 4294901760, %v10360_v31  ;;  %v10391_v52 = vsub.f32 %v2102_v33, %v10372_v41  ;;  %11413 = vst [vmem:[#allocation23_spill] sm:$0xff] %v10398_v57 }
  0x3e   : > { %v10387_v49 = vand.u32 4294901760, %v10366_v35  ;;  %v10396_v56 = vand.u32 4294901760, %v10381_v44  ;;  %11415 = vst [vmem:[#allocation25_spill] sm:$0xff] %v10403_v62 }
  0x3f   : > { %11408 = vst [vmem:[#allocation18_spill] sm:$0xff] %v10378_v43  ;;  %11411 = vst [vmem:[#allocation21_spill] sm:$0xff] %v10391_v52  ;;  %v931_v55 = vsub.f32 %v10360_v31, %v10378_v43  ;;  %v10410_v3 = vand.u32 4294901760, %v10391_v52 }
  0x40   : > { %9226 = vmatpush3.bf16.msra.mxu0 %v9223_v61  ;;  %11410 = vst [vmem:[#allocation20_spill] sm:$0xff] %v10387_v49  ;;  %11412 = vst [vmem:[#allocation22_spill] sm:$0xff] %v10396_v56  ;;  %v941_v0 = vsub.f32 %v10366_v35, %v10387_v49 }
  0x41   : > { %9228 = vmatprep.subr.bf16.mxu0 %v9227_v2  ;;  %11416 = vst [vmem:[#allocation26_spill] sm:$0xff] %v10410_v3 }
  0x44   : > { %9230 = vmatpush3.bf16.msra.mxu0 %v9227_v2 }
  0x45   : > { %9232 = vmatprep.subr.bf16.mxu0 %v9231_v5 }
  0x48   : > { %9234 = vmatpush3.bf16.msra.mxu0 %v9231_v5  ;;  %v10412_v5 = vand.u32 4294901760, %v931_v55 }
  0x49   : > { %9236 = vmatprep.subr.bf16.mxu0 %v9235_v6 }
  0x4b   : > { %8357 = vmatmul.mubr.f32.vlgmr.msra.gmra.mrb[0].mxu0 %v10220_v36 }
  0x4c   : > { %9238 = vmatpush3.bf16.msra.mxu0 %v9235_v6  ;;  %8375 = vmatprep.mubr.f32.mxu0 %v10229_v39  ;;  %v951_v6 = vsub.f32 %v10381_v44, %v10396_v56 }
  0x4d   : > { %9240 = vmatprep.subr.bf16.mxu0 %v9239_v7 }
  0x4e   : > { %v10440_v24 = vand.u32 4294901760, %v951_v6 }
  0x50   : > { %9242 = vmatpush3.bf16.msra.mxu0 %v9239_v7  ;;  %v10417_v7 = vsub.f32 %v2108_v46, %v10398_v57 }
  0x51   : > { %9244 = vmatprep.subr.bf16.mxu0 %v9243_v8 }
  0x52   : > { %11417 = vst [vmem:[#allocation27_spill] sm:$0xff] %v10417_v7  ;;  %v10437_v22 = vand.u32 4294901760, %v10417_v7 }
  0x54   : > { %9246 = vmatpush3.bf16.msra.mxu0 %v9243_v8  ;;  %11420 = vst [vmem:[#allocation30_spill] sm:$0xff] %v10437_v22  ;;  %v2203_v33 = vsub.f32 %v10417_v7, %v10437_v22 }
  0x55   : > { %9248 = vmatprep.subr.bf16.mxu0 %v9247_v9 }
  0x56   : > { %v10465_v42 = vand.u32 4294901760, %v2203_v33  ;;  %v10560_v33 = vld [vmem:[%s11307_s1 + $0x40] sm:$0xff] }
  0x58   : > { %9250 = vmatpush3.bf16.msra.mxu0 %v9247_v9  ;;  %11424 = vst [vmem:[#allocation34_spill] sm:$0xff] %v10465_v42 }
  0x59   : > { %9252 = vmatprep.subr.bf16.mxu0 %v10182_v14 }
  0x5b   : > { %8376 = vmatmul.mubr.f32.vlgmr.msra.gmra.mrb[0].mxu0 %v10232_v40 }
  0x5c   : > { %9254 = vmatpush3.bf16.msra.mxu0 %v10182_v14  ;;  %8394 = vmatprep.mubr.f32.mxu0 %v10243_v47 }
  0x5d   : > { %9256 = vmatprep.subr.bf16.mxu0 %v10186_v16 }
  0x60   : > { %9258 = vmatpush3.bf16.msra.mxu0 %v10186_v16 }
  0x61   : > { %9260 = vmatprep.subr.bf16.mxu0 %v10193_v20 }
  0x64   : > { %9262 = vmatpush3.bf16.msra.mxu0 %v10193_v20 }
  0x65   : > { %9264 = vmatprep.subr.bf16.mxu0 %v10222_v37 }
  0x68   : > { %9266 = vmatpush3.bf16.msra.mxu0 %v10222_v37 }
  0x69   : > { %9268 = vmatprep.subr.bf16.mxu0 %v9267_v10 }
  0x6b   : > { %8395 = vmatmul.mubr.f32.vlgmr.msra.gmra.mrb[0].mxu0 %v10246_v48 }
  0x6c   : > { %9270 = vmatpush3.bf16.msra.mxu0 %v9267_v10  ;;  %8413 = vmatprep.mubr.f32.mxu0 %v10215_v34 }
  0x6d   : > { %9272 = vmatprep.subr.bf16.mxu0 %v9271_v11 }
  0x70   : > { %9274 = vmatpush3.bf16.msra.mxu0 %v9271_v11  ;;  %v10426_v11 = vsub.f32 %v2111_v50, %v10403_v62  ;;  %v7765_v50 = vld [vmem:[%s11308_s2 + $0x20] sm:$0xff] }
  0x71   : > { %9276 = vmatprep.subr.bf16.mxu0 %v9275_v12 }
  0x72   : > { %11419 = vst [vmem:[#allocation29_spill] sm:$0xff] %v10426_v11  ;;  %v10445_v27 = vand.u32 4294901760, %v10426_v11 }
  0x74   : > { %9278 = vmatpush3.bf16.msra.mxu0 %v9275_v12  ;;  %11421 = vst [vmem:[#allocation31_spill] sm:$0xff] %v10445_v27  ;;  %v2213_v38 = vsub.f32 %v10426_v11, %v10445_v27 }
  0x75   : > { %9280 = vmatprep.subr.bf16.mxu0 %v9279_v13 }
  0x76   : > { %v10469_v46 = vand.u32 4294901760, %v2213_v38  ;;  %v10565_v38 = vld [vmem:[%s11307_s1 + $0x48] sm:$0xff] }
  0x78   : > { %9282 = vmatpush3.bf16.msra.mxu0 %v9279_v13  ;;  %v10429_v13 = vand.u32 4294901760, %v941_v0  ;;  %11425 = vst [vmem:[#allocation35_spill] sm:$0xff] %v10469_v46  ;;  %v7768_v0 = vld [vmem:[%s11308_s2 + $0x38] sm:$0xff] }
  0x79   : > { %9284 = vmatprep.subr.bf16.mxu0 %v10182_v14 }
  0x7b   : > { %8414 = vmatmul.mubr.f32.vlgmr.msra.gmra.mrb[0].mxu0 %v10220_v36 }
  0x7c   : > { %9286 = vmatpush3.bf16.msra.mxu0 %v10182_v14  ;;  %8432 = vmatprep.mubr.f32.mxu0 %v10215_v34  ;;  %v834_v14 = vld [vmem:[%s11308_s2] sm:$0xff] }
  0x7d   : > { %9288 = vmatprep.subr.bf16.mxu0 %v10186_v16  ;;  %v840_v15 = vsel %vm838_vm1, %v834_v14, 0 }
  0x7e   : > { %v10323_v17 = vand.u32 4294901760, %v840_v15 }
  0x80   : > { %9290 = vmatpush3.bf16.msra.mxu0 %v10186_v16  ;;  %v10326_v16 = vsub.f32 %v840_v15, %v10323_v17  ;;  %8449 = vmatprep.mubr.f32.mxu1 %v10323_v17 }
  0x81   : > { %9292 = vmatprep.subr.bf16.mxu0 %v10193_v20 }
  0x82   : > { %v10330_v18 = vand.u32 4294901760, %v10326_v16 }
  0x84   : > { %9294 = vmatpush3.bf16.msra.mxu0 %v10193_v20  ;;  %v921_v19 = vsub.f32 %v10326_v16, %v10330_v18 }
  0x85   : > { %9296 = vmatprep.subr.bf16.mxu0 %v10222_v37 }
  0x86   : > { %v10334_v20 = vand.u32 4294901760, %v921_v19  ;;  %v2183_v19 = vsub.f32 %v10391_v52, %v10410_v3 }
  0x88   : > { %9298 = vmatpush3.bf16.msra.mxu0 %v10222_v37  ;;  %11406 = vst [vmem:[#allocation16_spill] sm:$0xff] %v10334_v20  ;;  %v2105_v37 = vsel %vm838_vm1, %v7772_v30, 0  ;;  %v10451_v30 = vand.u32 4294901760, %v2183_v19 }
  0x89   : > { %v10383_v45 = vand.u32 4294901760, %v2105_v37 }
  0x8a   : > { %11422 = vst [vmem:[#allocation32_spill] sm:$0xff] %v10451_v30 }
  0x8b   : > { %8433 = vmatmul.mubr.f32.vlgmr.msra.gmra.mrb[0].mxu0 %v10220_v36  ;;  %11409 = vst [vmem:[#allocation19_spill] sm:$0xff] %v10383_v45  ;;  %v10401_v61 = vsub.f32 %v2105_v37, %v10383_v45 }
  0x8c   : > { %8439 = vmatprep.mubr.f32.mxu0 %v10334_v20 }
  0x8d   : > { %11414 = vst [vmem:[#allocation24_spill] sm:$0xff] %v10401_v61  ;;  %v10423_v10 = vand.u32 4294901760, %v10401_v61 }
  0x8f   : > { %11418 = vst [vmem:[#allocation28_spill] sm:$0xff] %v10423_v10  ;;  %v2193_v25 = vsub.f32 %v10401_v61, %v10423_v10 }
  0x91   : > { %v10457_v37 = vand.u32 4294901760, %v2193_v25 }
  0x93   : > { %11423 = vst [vmem:[#allocation33_spill] sm:$0xff] %v10457_v37 }
 0x15e   : > { %v8434_v51 = vpop.f32.mrb[0].mxu0 }
 0x15f   : > { %v855_v53 = vand.u32 4294901760, %v8434_v51  ;;  %v824_v54 = vpop.f32.mrb[1].mxu0 }
 0x160   : > { %v852_v58 = vand.u32 4294901760, %v824_v54 }
 0x161   : > { %v967_v63 = vsub.f32 %v8434_v51, %v855_v53  ;;  %v1471_v51 = vsel %vm838_vm1, %v7765_v50, 0 }
 0x162   : > { %v10407_v1 = vpack.c.bf16 %v855_v53, %v852_v58  ;;  %v960_v2 = vsub.f32 %v824_v54, %v852_v58  ;;  %v7766_v53 = vld [vmem:[%s11308_s2 + $0x28] sm:$0xff]  ;;  %v7767_v54 = vld [vmem:[%s11308_s2 + $0x30] sm:$0xff]  ;;  %v10507_v55 = vand.u32 4294901760, %v1471_v51 }
 0x163   : > { %v968_v4 = vand.u32 4294901760, %v967_v63  ;;  %v1474_v58 = vsel %vm838_vm1, %v7766_v53, 0  ;;  %v2737_v53 = vand.u32 4294901760, %v10560_v33 }
 0x164   : > { %v961_v8 = vand.u32 4294901760, %v960_v2  ;;  %v10419_v9 = vpack.c.bf16 %v967_v63, %v960_v2  ;;  %9300 = vmatprep.subr.bf16.mxu0 %v10407_v1  ;;  %11426 = vst [vmem:[#allocation36_spill] sm:$0xff] %v10507_v55 }
 0x165   : > { %v969_v12 = vsub.f32 %v967_v63, %v968_v4  ;;  %9302 = vmatpush3.bf16.msra.mxu0 %v10407_v1  ;;  %v1477_v63 = vsel %vm838_vm1, %v7767_v54, 0  ;;  %v2740_v54 = vand.u32 4294901760, %v10565_v38 }
 0x166   : > { %v962_v14 = vsub.f32 %v960_v2, %v961_v8  ;;  %v10431_v15 = vpack.c.bf16 %v968_v4, %v961_v8  ;;  %9348 = vmatprep.subr.bf16.mxu0 %v10407_v1  ;;  %v10520_v2 = vand.u32 4294901760, %v1474_v58  ;;  %v10525_v4 = vsub.f32 %v1471_v51, %v10507_v55 }
 0x167   : > { %v970_v21 = vand.u32 4294901760, %v969_v12  ;;  %v10527_v6 = vand.u32 4294901760, %v1477_v63  ;;  %v1480_v8 = vsel %vm838_vm1, %v7768_v0, 0 }
 0x168   : > { %v963_v23 = vand.u32 4294901760, %v962_v14  ;;  %8440 = vmatmul.mubr.f32.vlgmr.msra.gmra.mrb[2].mxu0 %v10412_v5  ;;  %11427 = vst [vmem:[#allocation37_spill] sm:$0xff] %v10520_v2  ;;  %11428 = vst [vmem:[#allocation38_spill] sm:$0xff] %v10525_v4  ;;  %v10533_v12 = vsub.f32 %v1474_v58, %v10520_v2  ;;  %v10535_v14 = vand.u32 4294901760, %v1480_v8  ;;  %v10540_v19 = vand.u32 4294901760, %v10525_v4 }
 0x169   : > { %9350 = vmatpush3.bf16.msra.mxu0 %v10407_v1  ;;  %8442 = vmatprep.mubr.f32.mxu0 %v10429_v13  ;;  %11429 = vst [vmem:[#allocation39_spill] sm:$0xff] %v10527_v6 }
 0x16a   : > { %v10449_v28 = vpack.c.bf16 %v970_v21, %v963_v23  ;;  %11430 = vst [vmem:[#allocation40_spill] sm:$0xff] %v10533_v12  ;;  %11431 = vst [vmem:[#allocation41_spill] sm:$0xff] %v10535_v14  ;;  %v10543_v21 = vsub.f32 %v1477_v63, %v10527_v6  ;;  %v10552_v23 = vand.u32 4294901760, %v10533_v12  ;;  %v10555_v25 = vsub.f32 %v1480_v8, %v10535_v14 }
 0x16b   : > { %11432 = vst [vmem:[#allocation42_spill] sm:$0xff] %v10540_v19  ;;  %v1552_v50 = vsub.f32 %v10525_v4, %v10540_v19 }
 0x16c   : > { %8443 = vmatmul.mubr.f32.gmra.mrb[4].mxu0 %v10440_v24  ;;  %9304 = vmatprep.subr.bf16.mxu1 %v10449_v28  ;;  %11433 = vst [vmem:[#allocation43_spill] sm:$0xff] %v10543_v21  ;;  %11434 = vst [vmem:[#allocation44_spill] sm:$0xff] %v10552_v23  ;;  %v10572_v51 = vand.u32 4294901760, %v10543_v21  ;;  %v1562_v58 = vsub.f32 %v10533_v12, %v10552_v23  ;;  %v10581_v63 = vand.u32 4294901760, %v10555_v25 }
 0x16d   : > { %9352 = vmatprep.subr.bf16.mxu0 %v10449_v28  ;;  %9306 = vmatpush3.bf16.msra.mxu1 %v10449_v28  ;;  %11435 = vst [vmem:[#allocation45_spill] sm:$0xff] %v10555_v25  ;;  %v10585_v0 = vand.u32 4294901760, %v1552_v50 }
 0x16e   : > { %9308 = vmatprep.subr.bf16.mxu1 %v10419_v9  ;;  %8559 = vmatprep.mubr.f32.mxu0 %v10451_v30  ;;  %11436 = vst [vmem:[#allocation46_spill] sm:$0xff] %v10572_v51  ;;  %11437 = vst [vmem:[#allocation47_spill] sm:$0xff] %v10581_v63  ;;  %v1572_v8 = vsub.f32 %v10543_v21, %v10572_v51  ;;  %v1582_v50 = vsub.f32 %v10555_v25, %v10581_v63 }
 0x16f   : > { %11438 = vst [vmem:[#allocation48_spill] sm:$0xff] %v10585_v0  ;;  %v10657_v30 = vsub.f32 %v10565_v38, %v2740_v54 }
 0x170   : > { %8450 = vmatmul.mubr.f32.vlgmr.msra.gmra.mrb[0].mxu1 %v10348_v26  ;;  %8560 = vmatmul.mubr.f32.vlgmr.msra.gmra.mrb[6].mxu0 %v10457_v37 }
 0x171   : > { %9354 = vmatpush3.bf16.msra.mxu0 %v10449_v28  ;;  %9310 = vmatpush3.bf16.msra.mxu1 %v10419_v9 }
 0x172   : > { %9356 = vmatprep.subr.bf16.mxu0 %v10419_v9  ;;  %9312 = vmatprep.subr.bf16.mxu1 %v10407_v1 }
 0x173   : > { %8452 = vmatprep.mubr.f32.mxu1 %v10354_v29  ;;  %8562 = vmatprep.mubr.f32.mxu0 %v10465_v42 }
 0x174   : > { %8453 = vmatmul.mubr.f32.gmra.mrb[2].mxu1 %v10362_v32  ;;  %8563 = vmatmul.mubr.f32.gmra.mrb[8].mxu0 %v10469_v46 }
 0x175   : > { %8459 = vmatprep.mubr.f32.mxu1 %v10326_v16  ;;  %8569 = vmatprep.mubr.f32.mxu0 %v10372_v41 }
 0x178   : > { %8460 = vmatmul.mubr.f32.vlgmr.msra.gmra.mrb[0].mxu1 %v10360_v31  ;;  %8570 = vmatmul.mubr.f32.vlgmr.msra.gmra.mrb[6].mxu0 %v10383_v45 }
 0x179   : > { %9314 = vmatpush3.bf16.msra.mxu1 %v10407_v1  ;;  %9358 = vmatpush3.bf16.msra.mxu0 %v10419_v9 }
 0x17a   : > { %9316 = vmatprep.subr.bf16.mxu1 %v10431_v15  ;;  %9360 = vmatprep.subr.bf16.mxu0 %v10407_v1 }
 0x17b   : > { %8462 = vmatprep.mubr.f32.mxu1 %v10366_v35  ;;  %8572 = vmatprep.mubr.f32.mxu0 %v10398_v57 }
 0x17c   : > { %8463 = vmatmul.mubr.f32.gmra.mrb[2].mxu1 %v10381_v44  ;;  %8573 = vmatmul.mubr.f32.gmra.mrb[8].mxu0 %v10403_v62 }
 0x17d   : > { %8469 = vmatprep.mubr.f32.mxu1 %v10330_v18  ;;  %8579 = vmatprep.mubr.f32.mxu0 %v10391_v52  ;;  %v7782_v52 = vld [vmem:[%s11307_s1 + $0x68] sm:$0xff] }
 0x180   : > { %8470 = vmatmul.mubr.f32.vlgmr.msra.gmra.mrb[0].mxu1 %v10378_v43  ;;  %8580 = vmatmul.mubr.f32.vlgmr.msra.gmra.mrb[6].mxu0 %v10401_v61  ;;  %v7781_v61 = vld [vmem:[%s11307_s1 + $0x60] sm:$0xff] }
 0x181   : > { %9318 = vmatpush3.bf16.msra.mxu1 %v10431_v15  ;;  %9362 = vmatpush3.bf16.msra.mxu0 %v10407_v1 }
 0x182   : > { %9320 = vmatprep.subr.bf16.mxu1 %v10407_v1  ;;  %9364 = vmatprep.subr.bf16.mxu0 %v10431_v15 }
 0x183   : > { %8472 = vmatprep.mubr.f32.mxu1 %v10387_v49  ;;  %8582 = vmatprep.mubr.f32.mxu0 %v10417_v7 }
 0x184   : > { %8473 = vmatmul.mubr.f32.gmra.mrb[2].mxu1 %v10396_v56  ;;  %8583 = vmatmul.mubr.f32.gmra.mrb[8].mxu0 %v10426_v11  ;;  %v10612_v11 = vand.u32 4294901760, %v1582_v50  ;;  %v2839_v56 = vand.u32 4294901760, %v10657_v30 }
 0x185   : > { %8479 = vmatprep.mubr.f32.mxu1 %v10323_v17  ;;  %8589 = vmatprep.mubr.f32.mxu0 %v10410_v3  ;;  %v7779_v3 = vld [vmem:[%s11307_s1 + $0x50] sm:$0xff] }
 0x186   : > { %11441 = vst [vmem:[#allocation51_spill] sm:$0xff] %v10612_v11  ;;  %v2840_v38 = vsub.f32 %v10657_v30, %v2839_v56 }
 0x188   : > { %8480 = vmatmul.mubr.f32.vlgmr.msra.gmra.mrb[0].mxu1 %v10348_v26  ;;  %8590 = vmatmul.mubr.f32.vlgmr.msra.gmra.mrb[6].mxu0 %v10423_v10  ;;  %v10602_v10 = vand.u32 4294901760, %v1572_v8  ;;  %v2743_v8 = vand.u32 4294901760, %v7779_v3 }
 0x189   : > { %9322 = vmatpush3.bf16.msra.mxu1 %v10407_v1  ;;  %9366 = vmatpush3.bf16.msra.mxu0 %v10431_v15 }
 0x18a   : > { %9324 = vmatprep.subr.bf16.mxu1 %v10407_v1  ;;  %9368 = vmatprep.subr.bf16.mxu0 %v10407_v1  ;;  %11440 = vst [vmem:[#allocation50_spill] sm:$0xff] %v10602_v10 }
 0x18b   : > { %8482 = vmatprep.mubr.f32.mxu1 %v10354_v29  ;;  %8592 = vmatprep.mubr.f32.mxu0 %v10437_v22  ;;  %v10596_v22 = vand.u32 4294901760, %v1562_v58  ;;  %v7780_v58 = vld [vmem:[%s11307_s1 + $0x58] sm:$0xff] }
 0x18c   : > { %8483 = vmatmul.mubr.f32.gmra.mrb[2].mxu1 %v10362_v32  ;;  %8593 = vmatmul.mubr.f32.gmra.mrb[8].mxu0 %v10445_v27  ;;  %v10589_v27 = vpack.c.bf16 %v2740_v54, %v2737_v53  ;;  %v2746_v7 = vand.u32 4294901760, %v7780_v58 }
 0x18d   : > { %8489 = vmatprep.mubr.f32.mxu1 %v10323_v17  ;;  %8599 = vmatprep.mubr.f32.mxu0 %v10372_v41  ;;  %11439 = vst [vmem:[#allocation49_spill] sm:$0xff] %v10596_v22 }
 0x18e   : > { %v10625_v50 = vpack.c.bf16 %v2746_v7, %v2743_v8  ;;  %v10678_v54 = vsub.f32 %v7780_v58, %v2746_v7 }
 0x190   : > { %8490 = vmatmul.mubr.f32.vlgmr.msra.gmra.mrb[0].mxu1 %v10348_v26  ;;  %8600 = vmatmul.mubr.f32.vlgmr.msra.gmra.mrb[6].mxu0 %v10383_v45 }
 0x191   : > { %9326 = vmatpush3.bf16.msra.mxu1 %v10407_v1  ;;  %9370 = vmatpush3.bf16.msra.mxu0 %v10407_v1 }
 0x192   : > { %9328 = vmatprep.subr.bf16.mxu1 %v10449_v28  ;;  %8492 = vmatprep.mubr.f32.mxu1 %v10354_v29 }
 0x193   : > { %8602 = vmatprep.mubr.f32.mxu0 %v10398_v57  ;;  %9372 = vmatprep.subr.bf16.mxu0 %v10589_v27 }
 0x194   : > { %8493 = vmatmul.mubr.f32.gmra.mrb[2].mxu1 %v10362_v32  ;;  %8603 = vmatmul.mubr.f32.gmra.mrb[8].mxu0 %v10403_v62 }
 0x195   : > { %8499 = vmatprep.mubr.f32.mxu1 %v10585_v0  ;;  %8609 = vmatprep.mubr.f32.mxu0 %v10372_v41  ;;  %v7783_v41 = vld [vmem:[%s11307_s1 + $0x70] sm:$0xff] }
 0x198   : > { %8500 = vmatmul.mubr.f32.vlgmr.msra.gmra.mrb[4].mxu1 %v10596_v22  ;;  %8610 = vmatmul.mubr.f32.vlgmr.msra.gmra.mrb[6].mxu0 %v10383_v45  ;;  %v2752_v45 = vand.u32 4294901760, %v7782_v52 }
 0x199   : > { %9330 = vmatpush3.bf16.msra.mxu1 %v10449_v28  ;;  %8502 = vmatprep.mubr.f32.mxu1 %v10602_v10  ;;  %v2749_v28 = vand.u32 4294901760, %v7781_v61 }
 0x19a   : > { %9332 = vmatprep.subr.bf16.mxu1 %v10419_v9  ;;  %8612 = vmatprep.mubr.f32.mxu0 %v10398_v57  ;;  %v7784_v57 = vld [vmem:[%s11307_s1 + $0x78] sm:$0xff] }
 0x19b   : > { %9374 = vmatpush3.bf16.msra.mxu0 %v10589_v27  ;;  %v10638_v46 = vpack.c.bf16 %v2752_v45, %v2749_v28  ;;  %v2758_v42 = vand.u32 4294901760, %v7784_v57  ;;  %v10686_v43 = vsub.f32 %v7781_v61, %v2749_v28 }
 0x19c   : > { %8503 = vmatmul.mubr.f32.gmra.mrb[6].mxu1 %v10612_v11  ;;  %8613 = vmatmul.mubr.f32.gmra.mrb[8].mxu0 %v10403_v62  ;;  %v2755_v62 = vand.u32 4294901760, %v7783_v41 }
 0x19d   : > { %8509 = vmatprep.mubr.f32.mxu1 %v10507_v55  ;;  %9376 = vmatprep.subr.bf16.mxu0 %v10625_v50 }
 0x19e   : > { %8631 = vmatprep.mubr.f32.mxu0 %v10264_v59  ;;  %v10647_v37 = vpack.c.bf16 %v2758_v42, %v2755_v62  ;;  %v10654_v59 = vsub.f32 %v10560_v33, %v2737_v53  ;;  %v10676_v53 = vsub.f32 %v7779_v3, %v2743_v8  ;;  %v10688_v3 = vsub.f32 %v7782_v52, %v2752_v45 }
 0x19f   : > { %9378 = vmatpush3.bf16.msra.mxu0 %v10625_v50  ;;  %v11355_v8 = vand.u32 4294901760, %v10686_v43  ;;  %v10700_v28 = vsub.f32 %v7783_v41, %v2755_v62  ;;  %v10702_v45 = vsub.f32 %v7784_v57, %v2758_v42 }
 0x1a0   : > { %8510 = vmatmul.mubr.f32.vlgmr.msra.gmra.mrb[4].mxu1 %v10520_v2  ;;  %9380 = vmatprep.subr.bf16.mxu0 %v10638_v46  ;;  %v2846_v49 = vand.u32 4294901760, %v10676_v53  ;;  %v11354_v61 = vand.u32 4294901760, %v10688_v3 }
 0x1a1   : > { %9334 = vmatpush3.bf16.msra.mxu1 %v10419_v9  ;;  %8512 = vmatprep.mubr.f32.mxu1 %v10527_v6  ;;  %v11351_v9 = vand.u32 4294901760, %v10654_v59  ;;  %v2861_v52 = vsub.f32 %v10686_v43, %v11355_v8  ;;  %v2874_v57 = vand.u32 4294901760, %v10700_v28  ;;  %v2881_v62 = vand.u32 4294901760, %v10702_v45 }
 0x1a2   : > { %9336 = vmatprep.subr.bf16.mxu1 %v10407_v1  ;;  %v2868_v41 = vsub.f32 %v10688_v3, %v11354_v61 }
 0x1a3   : > { %9382 = vmatpush3.bf16.msra.mxu0 %v10638_v46  ;;  %v2833_v33 = vsub.f32 %v10654_v59, %v11351_v9  ;;  %v2853_v9 = vand.u32 4294901760, %v10678_v54  ;;  %v2862_v42 = vand.u32 4294901760, %v2861_v52  ;;  %v9411_v52 = vpack.c.bf16 %v10688_v3, %v10686_v43 }
 0x1a4   : > { %8513 = vmatmul.mubr.f32.gmra.mrb[6].mxu1 %v10535_v14  ;;  %9384 = vmatprep.subr.bf16.mxu0 %v10647_v37 }
 0x1a5   : > { %8519 = vmatprep.mubr.f32.mxu1 %v10525_v4  ;;  %v2854_v58 = vsub.f32 %v10678_v54, %v2853_v9 }
 0x1a7   : > { %9386 = vmatpush3.bf16.msra.mxu0 %v10647_v37 }
 0x1a8   : > { %8520 = vmatmul.mubr.f32.vlgmr.msra.gmra.mrb[4].mxu1 %v10533_v12 }
 0x1a9   : > { %9338 = vmatpush3.bf16.msra.mxu1 %v10407_v1  ;;  %8522 = vmatprep.mubr.f32.mxu1 %v10543_v21 }
 0x1aa   : > { %9340 = vmatprep.subr.bf16.mxu1 %v10431_v15  ;;  %8632 = vmatmul.mubr.f32.vlgmr.msra.gmra.mrb[10].mxu0 %v10266_v60  ;;  %v2841_v60 = vand.u32 4294901760, %v2840_v38  ;;  %v2875_v38 = vsub.f32 %v10700_v28, %v2874_v57 }
 0x1ab   : > { %8733 = vmatprep.mubr.f32.mxu0 %v10334_v20  ;;  %v2834_v20 = vand.u32 4294901760, %v2833_v33  ;;  %v2869_v33 = vand.u32 4294901760, %v2868_v41  ;;  %v11443_v41 = vand.u32 4294901760, %v10686_v43 }
 0x1ac   : > { %8523 = vmatmul.mubr.f32.gmra.mrb[6].mxu1 %v10555_v25  ;;  %v2876_v61 = vand.u32 4294901760, %v2875_v38 }
 0x1ad   : > { %8529 = vmatprep.mubr.f32.mxu1 %v10540_v19  ;;  %v9387_v7 = vpack.c.bf16 %v2841_v60, %v2834_v20  ;;  %v2855_v20 = vand.u32 4294901760, %v2854_v58  ;;  %v9395_v58 = vpack.c.bf16 %v2869_v33, %v2862_v42 }
 0x1b0   : > { %8530 = vmatmul.mubr.f32.vlgmr.msra.gmra.mrb[4].mxu1 %v10552_v23 }
 0x1b1   : > { %9342 = vmatpush3.bf16.msra.mxu1 %v10431_v15  ;;  %8532 = vmatprep.mubr.f32.mxu1 %v10572_v51  ;;  %v2847_v15 = vsub.f32 %v10676_v53, %v2846_v49 }
 0x1b2   : > { %9344 = vmatprep.subr.bf16.mxu1 %v10407_v1 }
 0x1b3   : > { %v2848_v60 = vand.u32 4294901760, %v2847_v15  ;;  %v2882_v15 = vsub.f32 %v10702_v45, %v2881_v62 }
 0x1b4   : > { %8533 = vmatmul.mubr.f32.gmra.mrb[6].mxu1 %v10581_v63 }
 0x1b5   : > { %8539 = vmatprep.mubr.f32.mxu1 %v10507_v55  ;;  %v2883_v8 = vand.u32 4294901760, %v2882_v15 }
 0x1b8   : > { %8540 = vmatmul.mubr.f32.vlgmr.msra.gmra.mrb[4].mxu1 %v10520_v2 }
 0x1b9   : > { %9346 = vmatpush3.bf16.msra.mxu1 %v10407_v1  ;;  %8542 = vmatprep.mubr.f32.mxu1 %v10527_v6  ;;  %v9391_v1 = vpack.c.bf16 %v2855_v20, %v2848_v60  ;;  %v9399_v60 = vpack.c.bf16 %v2883_v8, %v2876_v61  ;;  %v9403_v20 = vpack.c.bf16 %v10657_v30, %v10654_v59  ;;  %v11442_v61 = vand.u32 4294901760, %v10654_v59 }
 0x1ba   : > { %9388 = vmatprep.subr.bf16.mxu1 %v9387_v7  ;;  %v9415_v8 = vpack.c.bf16 %v10702_v45, %v10700_v28  ;;  %v9439_v45 = vpack.c.bf16 %v2853_v9, %v2846_v49  ;;  %v11444_v59 = vand.u32 4294901760, %v10688_v3 }
 0x1bb   : > { %v9435_v28 = vpack.c.bf16 %v2839_v56, %v11442_v61  ;;  %v9447_v56 = vpack.c.bf16 %v2881_v62, %v2874_v57  ;;  %v7776_v61 = vld [vmem:[%s11309_s3 + $0xf] ss:$0 sm:$0xff] }
 0x1bc   : > { %8543 = vmatmul.mubr.f32.gmra.mrb[6].mxu1 %v10535_v14  ;;  %v9443_v30 = vpack.c.bf16 %v11444_v59, %v11443_v41 }
 0x1bd   : > { %8549 = vmatprep.mubr.f32.mxu1 %v10507_v55 }
 0x1c0   : > { %8550 = vmatmul.mubr.f32.vlgmr.msra.gmra.mrb[4].mxu1 %v10520_v2 }
 0x1c1   : > { %9390 = vmatpush3.bf16.msra.mxu1 %v9387_v7  ;;  %8552 = vmatprep.mubr.f32.mxu1 %v10527_v6  ;;  %v9407_v7 = vpack.c.bf16 %v10678_v54, %v10676_v53 }
 0x1c2   : > { %9392 = vmatprep.subr.bf16.mxu1 %v9391_v1 }
 0x1c4   : > { %8553 = vmatmul.mubr.f32.gmra.mrb[6].mxu1 %v10535_v14 }
 0x1c5   : > { %9394 = vmatpush3.bf16.msra.mxu1 %v9391_v1  ;;  %8650 = vmatprep.mubr.f32.mxu1 %v10215_v34 }
 0x1c6   : > { %9396 = vmatprep.subr.bf16.mxu1 %v9395_v58 }
 0x1c9   : > { %9398 = vmatpush3.bf16.msra.mxu1 %v9395_v58 }
 0x1ca   : > { %9400 = vmatprep.subr.bf16.mxu1 %v9399_v60 }
 0x1cd   : > { %9402 = vmatpush3.bf16.msra.mxu1 %v9399_v60  ;;  %v7763_v60 = vld [vmem:[%s11309_s3] ss:$0 sm:$0xff] }
 0x1ce   : > { %9404 = vmatprep.subr.bf16.mxu1 %v9403_v20 }
 0x1d0   : > { %8651 = vmatmul.mubr.f32.vlgmr.msra.gmra.mrb[8].mxu1 %v10220_v36 }
 0x1d1   : > { %9406 = vmatpush3.bf16.msra.mxu1 %v9403_v20  ;;  %8669 = vmatprep.mubr.f32.mxu1 %v10229_v39  ;;  %v7764_v20 = vld [vmem:[%s11309_s3 + $0x9] ss:$0 sm:$0xff] }
 0x1d2   : > { %9408 = vmatprep.subr.bf16.mxu1 %v9407_v7 }
 0x1d5   : > { %9410 = vmatpush3.bf16.msra.mxu1 %v9407_v7  ;;  %v7769_v7 = vld [vmem:[%s11309_s3 + $0x3] ss:$0 sm:$0xff] }
 0x1d6   : > { %9412 = vmatprep.subr.bf16.mxu1 %v9411_v52 }
 0x1d9   : > { %9414 = vmatpush3.bf16.msra.mxu1 %v9411_v52  ;;  %v7770_v52 = vld [vmem:[%s11309_s3 + $0xc] ss:$0 sm:$0xff] }
 0x1da   : > { %9416 = vmatprep.subr.bf16.mxu1 %v9415_v8 }
 0x1dd   : > { %9418 = vmatpush3.bf16.msra.mxu1 %v9415_v8  ;;  %v7775_v8 = vld [vmem:[%s11309_s3 + $0x6] ss:$0 sm:$0xff] }
 0x1de   : > { %9420 = vmatprep.subr.bf16.mxu1 %v10589_v27 }
 0x1e0   : > { %8670 = vmatmul.mubr.f32.vlgmr.msra.gmra.mrb[8].mxu1 %v10232_v40 }
 0x1e1   : > { %9422 = vmatpush3.bf16.msra.mxu1 %v10589_v27  ;;  %8688 = vmatprep.mubr.f32.mxu1 %v10243_v47 }
 0x1e2   : > { %9424 = vmatprep.subr.bf16.mxu1 %v10625_v50 }
 0x1e5   : > { %9426 = vmatpush3.bf16.msra.mxu1 %v10625_v50 }
 0x1e6   : > { %9428 = vmatprep.subr.bf16.mxu1 %v10638_v46 }
 0x1e9   : > { %9430 = vmatpush3.bf16.msra.mxu1 %v10638_v46 }
 0x1ea   : > { %9432 = vmatprep.subr.bf16.mxu1 %v10647_v37 }
 0x1ed   : > { %9434 = vmatpush3.bf16.msra.mxu1 %v10647_v37 }
 0x1ee   : > { %9436 = vmatprep.subr.bf16.mxu1 %v9435_v28 }
 0x1f0   : > { %8689 = vmatmul.mubr.f32.vlgmr.msra.gmra.mrb[8].mxu1 %v10246_v48 }
 0x1f1   : > { %9438 = vmatpush3.bf16.msra.mxu1 %v9435_v28  ;;  %8707 = vmatprep.mubr.f32.mxu1 %v10215_v34 }
 0x1f2   : > { %9440 = vmatprep.subr.bf16.mxu1 %v9439_v45 }
 0x1f5   : > { %9442 = vmatpush3.bf16.msra.mxu1 %v9439_v45 }
 0x1f6   : > { %9444 = vmatprep.subr.bf16.mxu1 %v9443_v30 }
 0x1f9   : > { %9446 = vmatpush3.bf16.msra.mxu1 %v9443_v30 }
 0x1fa   : > { %9448 = vmatprep.subr.bf16.mxu1 %v9447_v56 }
 0x1fd   : > { %9450 = vmatpush3.bf16.msra.mxu1 %v9447_v56 }
 0x1fe   : > { %9452 = vmatprep.subr.bf16.mxu1 %v10589_v27 }
 0x200   : > { %8708 = vmatmul.mubr.f32.vlgmr.msra.gmra.mrb[8].mxu1 %v10220_v36 }
 0x201   : > { %9454 = vmatpush3.bf16.msra.mxu1 %v10589_v27  ;;  %8726 = vmatprep.mubr.f32.mxu1 %v10215_v34 }
 0x202   : > { %9456 = vmatprep.subr.bf16.mxu1 %v10625_v50 }
 0x205   : > { %9458 = vmatpush3.bf16.msra.mxu1 %v10625_v50 }
 0x206   : > { %9460 = vmatprep.subr.bf16.mxu1 %v10638_v46 }
 0x209   : > { %9462 = vmatpush3.bf16.msra.mxu1 %v10638_v46 }
 0x20a   : > { %9464 = vmatprep.subr.bf16.mxu1 %v10647_v37 }
 0x20d   : > { %9466 = vmatpush3.bf16.msra.mxu1 %v10647_v37 }
 0x210   : > { %8727 = vmatmul.mubr.f32.vlgmr.msra.gmra.mrb[8].mxu1 %v10220_v36 }
 0x211   : > { %8793 = vmatprep.mubr.f32.mxu1 %v10585_v0 }
 0x23b   : > { %v8441_v43 = vpop.f32.mrb[2].mxu0 }
 0x23c   : > { %v924_v49 = vpop.f32.mrb[3].mxu0 }
 0x23f   : > { %v8444_v27 = vpop.f32.mrb[4].mxu0 }
 0x240   : > { %v944_v9 = vpop.f32.mrb[5].mxu0 }
 0x263   : > { %v8491_v53 = vpop.f32.mrb[0].mxu1 }
 0x264   : > { %v9707_v54 = vadd.f32 %v8491_v53, %v8441_v43  ;;  %v1417_v3 = vpop.f32.mrb[1].mxu1 }
 0x265   : > { %v9708_v50 = vadd.f32 %v1417_v3, %v924_v49 }
 0x266   : > { %v1445_v28 = vmul.f32 %v9707_v54, %v7763_v60  ;;  %v1458_v45 = vmul.f32 %v9707_v54, %v7764_v20 }
 0x267   : > { %v8494_v57 = vpop.f32.mrb[2].mxu1  ;;  %v1444_v41 = vmul.f32 %v9708_v50, %v7763_v60  ;;  %v1457_v59 = vmul.f32 %v9708_v50, %v7764_v20 }
 0x268   : > { %v9709_v62 = vadd.f32 %v8494_v57, %v8444_v27  ;;  %v1429_v1 = vpop.f32.mrb[3].mxu1 }
 0x269   : > { %v9710_v46 = vadd.f32 %v1429_v1, %v944_v9 }
 0x26a   : > { %v1447_v30 = vmul.f32 %v9709_v62, %v7763_v60  ;;  %v1460_v56 = vmul.f32 %v9709_v62, %v7764_v20 }
 0x26b   : > { %v8611_v42 = vpop.f32.mrb[6].mxu0  ;;  %v1446_v43 = vmul.f32 %v9710_v46, %v7763_v60  ;;  %v1459_v49 = vmul.f32 %v9710_v46, %v7764_v20 }
 0x26c   : > { %v2679_v33 = vpop.f32.mrb[7].mxu0  ;;  %v2707_v57 = vmul.f32 %v8611_v42, %v7775_v8  ;;  %v2720_v1 = vmul.f32 %v8611_v42, %v7776_v61 }
 0x26d   : > { %v2706_v47 = vmul.f32 %v7775_v8, %v2679_v33  ;;  %v2719_v40 = vmul.f32 %v7776_v61, %v2679_v33 }
 0x26f   : > { %v8614_v38 = vpop.f32.mrb[8].mxu0 }
 0x270   : > { %v2691_v37 = vpop.f32.mrb[9].mxu0  ;;  %v2709_v34 = vmul.f32 %v8614_v38, %v7775_v8  ;;  %v2722_v54 = vmul.f32 %v8614_v38, %v7776_v61 }
 0x271   : > { %v2708_v62 = vmul.f32 %v7775_v8, %v2691_v37  ;;  %v2721_v60 = vmul.f32 %v7776_v61, %v2691_v37 }
 0x27d   : > { %v8633_v15 = vpop.f32.mrb[10].mxu0 }
 0x27e   : > { %v2815_v58 = vpop.f32.mrb[11].mxu0 }
 0x293   : > { %v8551_v27 = vpop.f32.mrb[4].mxu1 }
 0x294   : > { %v2076_v9 = vmul.f32 %v8551_v27, %v7769_v7  ;;  %v2089_v53 = vmul.f32 %v8551_v27, %v7770_v52  ;;  %v2048_v3 = vpop.f32.mrb[5].mxu1 }
 0x295   : > { %v2075_v0 = vmul.f32 %v7769_v7, %v2048_v3  ;;  %v2088_v48 = vmul.f32 %v7770_v52, %v2048_v3 }
 0x296   : > { %v2080_v39 = vadd.f32 %v2076_v9, %v1445_v28  ;;  %v2093_v36 = vadd.f32 %v2089_v53, %v1458_v45  ;;  %v11445_v53 = vld [vmem:[#allocation42_spill] sm:$0xff] }
 0x297   : > { %v2079_v63 = vadd.f32 %v2075_v0, %v1444_v41  ;;  %v2092_v50 = vadd.f32 %v2088_v48, %v1457_v59  ;;  %v8554_v51 = vpop.f32.mrb[6].mxu1 }
 0x298   : > { %v10787_v46 = vadd.f32 %v2707_v57, %v2080_v39  ;;  %v10789_v20 = vadd.f32 %v2720_v1, %v2093_v36  ;;  %v2078_v27 = vmul.f32 %v8554_v51, %v7769_v7  ;;  %v2091_v23 = vmul.f32 %v8554_v51, %v7770_v52  ;;  %v2060_v42 = vpop.f32.mrb[7].mxu1  ;;  %v11446_v57 = vld [vmem:[#allocation18_spill] sm:$0xff]  ;;  %v11447_v1 = vld [vmem:[#allocation44_spill] sm:$0xff] }
 0x299   : > { %v10791_v19 = vadd.f32 %v2706_v47, %v2079_v63  ;;  %v10793_v3 = vadd.f32 %v2719_v40, %v2092_v50  ;;  %v2077_v33 = vmul.f32 %v7769_v7, %v2060_v42  ;;  %v2090_v28 = vmul.f32 %v7770_v52, %v2060_v42  ;;  %v7792_v50 = vld [vmem:[%s11307_s1 + $0x88] sm:$0xff] }
 0x29a   : > { %v2082_v45 = vadd.f32 %v2078_v27, %v1447_v30  ;;  %v2095_v38 = vadd.f32 %v2091_v23, %v1460_v56  ;;  %v5171_v42 = vand.u32 4294901760, %v7792_v50 }
 0x29b   : > { %v2081_v0 = vadd.f32 %v2077_v33, %v1446_v43  ;;  %v2094_v48 = vadd.f32 %v2090_v28, %v1459_v49  ;;  %v11450_v33 = vld [vmem:[#allocation22_spill] sm:$0xff]  ;;  %v11451_v28 = vld [vmem:[#allocation47_spill] sm:$0xff] }
 0x29c   : > { %v10795_v41 = vadd.f32 %v2709_v34, %v2082_v45  ;;  %v10797_v37 = vadd.f32 %v2722_v54, %v2095_v38  ;;  %v7791_v54 = vld [vmem:[%s11307_s1 + $0x80] sm:$0xff]  ;;  %v7793_v38 = vld [vmem:[%s11307_s1 + $0x90] sm:$0xff] }
 0x29d   : > { %v10799_v39 = vadd.f32 %v2708_v62, %v2081_v0  ;;  %v10801_v36 = vadd.f32 %v2721_v60, %v2094_v48  ;;  %v11448_v62 = vld [vmem:[#allocation20_spill] sm:$0xff]  ;;  %v11449_v60 = vld [vmem:[#allocation46_spill] sm:$0xff]  ;;  %v5168_v27 = vand.u32 4294901760, %v7791_v54  ;;  %v7794_v0 = vld [vmem:[%s11307_s1 + $0x98] sm:$0xff] }
 0x29f   : > { %v10871_v45 = vpack.c.bf16 %v5171_v42, %v5168_v27  ;;  %v10883_v48 = vsub.f32 %v7791_v54, %v5168_v27 }
 0x2e3   : > { %v8728_v51 = vpop.f32.mrb[8].mxu1 }
 0x2e4   : > { %v9711_v8 = vadd.f32 %v8728_v51, %v8633_v15  ;;  %v3306_v47 = vpop.f32.mrb[9].mxu1  ;;  %v7795_v51 = vld [vmem:[%s11307_s1 + $0xa0] sm:$0xff] }
 0x2e5   : > { %v9712_v63 = vadd.f32 %v3306_v47, %v2815_v58  ;;  %v10893_v47 = vsub.f32 %v7792_v50, %v5171_v42 }
 0x2e6   : > { %v3320_v40 = vand.u32 4294901760, %v9711_v8 }
 0x2e7   : > { %v3317_v61 = vand.u32 4294901760, %v9712_v63 }
 0x2e8   : > { %v3432_v7 = vsub.f32 %v9711_v8, %v3320_v40  ;;  %v7796_v8 = vld [vmem:[%s11307_s1 + $0xa8] sm:$0xff] }
 0x2e9   : > { %v10803_v52 = vpack.c.bf16 %v3320_v40, %v3317_v61  ;;  %v3425_v23 = vsub.f32 %v9712_v63, %v3317_v61  ;;  %v5174_v63 = vand.u32 4294901760, %v7793_v38  ;;  %v5177_v40 = vand.u32 4294901760, %v7794_v0 }
 0x2ea   : > { %v3433_v59 = vand.u32 4294901760, %v3432_v7  ;;  %v5180_v61 = vand.u32 4294901760, %v7795_v51 }
 0x2eb   : > { %v3426_v30 = vand.u32 4294901760, %v3425_v23  ;;  %v10805_v34 = vpack.c.bf16 %v3432_v7, %v3425_v23  ;;  %9468 = vmatprep.subr.bf16.mxu0 %v10803_v52  ;;  %9492 = vmatprep.subr.bf16.mxu1 %v10803_v52 }
 0x2ec   : > { %v3434_v56 = vsub.f32 %v3432_v7, %v3433_v59  ;;  %9470 = vmatpush3.bf16.msra.mxu0 %v10803_v52  ;;  %9494 = vmatpush3.bf16.msra.mxu1 %v10803_v52  ;;  %v5183_v7 = vand.u32 4294901760, %v7796_v8 }
 0x2ed   : > { %v3427_v15 = vsub.f32 %v3425_v23, %v3426_v30  ;;  %v10811_v58 = vpack.c.bf16 %v3433_v59, %v3426_v30  ;;  %v11373_v23 = vand.u32 4294901760, %v10883_v48  ;;  %v7797_v59 = vld [vmem:[%s11307_s1 + $0xb0] sm:$0xff]  ;;  %v7798_v30 = vld [vmem:[%s11307_s1 + $0xb8] sm:$0xff] }
 0x2ee   : > { %v3435_v43 = vand.u32 4294901760, %v3434_v56  ;;  %v11374_v56 = vand.u32 4294901760, %v10893_v47  ;;  %v10919_v54 = vpack.c.bf16 %v5183_v7, %v5180_v61  ;;  %v5186_v50 = vand.u32 4294901760, %v7797_v59 }
 0x2ef   : > { %v3428_v49 = vand.u32 4294901760, %v3427_v15  ;;  %8734 = vmatmul.mubr.f32.vlgmr.msra.gmra.mrb[12].mxu0 %v10412_v5  ;;  %8794 = vmatmul.mubr.f32.vlgmr.msra.gmra.mrb[10].mxu1 %v10596_v22  ;;  %v10909_v15 = vpack.c.bf16 %v5177_v40, %v5174_v63  ;;  %v5189_v27 = vand.u32 4294901760, %v7798_v30  ;;  %v5264_v42 = vsub.f32 %v10883_v48, %v11373_v23 }
 0x2f0   : > { %8736 = vmatprep.mubr.f32.mxu0 %v10429_v13  ;;  %8796 = vmatprep.mubr.f32.mxu1 %v10602_v10 }
 0x2f1   : > { %v10817_v9 = vpack.c.bf16 %v3435_v43, %v3428_v49  ;;  %v10911_v43 = vsub.f32 %v7793_v38, %v5174_v63  ;;  %v10913_v49 = vsub.f32 %v7794_v0, %v5177_v40  ;;  %v5271_v38 = vsub.f32 %v10893_v47, %v11374_v56 }
 0x2f2   : > { %v10929_v0 = vsub.f32 %v7795_v51, %v5180_v61  ;;  %v10931_v63 = vsub.f32 %v7796_v8, %v5183_v7  ;;  %v10941_v51 = vpack.c.bf16 %v5189_v27, %v5186_v50  ;;  %v11453_v8 = vld [vmem:[#allocation14_spill] sm:$0xff]  ;;  %v5265_v61 = vand.u32 4294901760, %v5264_v42 }
 0x2f3   : > { %8737 = vmatmul.mubr.f32.gmra.mrb[14].mxu0 %v10440_v24  ;;  %9472 = vmatprep.subr.bf16.mxu0 %v10817_v9  ;;  %v11379_v40 = vand.u32 4294901760, %v10911_v43  ;;  %v5272_v7 = vand.u32 4294901760, %v5271_v38  ;;  %v11456_v42 = vld [vmem:[#allocation34_spill] sm:$0xff] }
 0x2f4   : > { %8797 = vmatmul.mubr.f32.gmra.mrb[12].mxu1 %v10612_v11  ;;  %9496 = vmatprep.subr.bf16.mxu1 %v10817_v9  ;;  %v11378_v56 = vand.u32 4294901760, %v10929_v0  ;;  %v11380_v23 = vand.u32 4294901760, %v10931_v63 }
 0x2f5   : > { %9474 = vmatpush3.bf16.msra.mxu0 %v10817_v9  ;;  %9498 = vmatpush3.bf16.msra.mxu1 %v10817_v9  ;;  %v9555_v38 = vpack.c.bf16 %v5272_v7, %v5265_v61  ;;  %v11458_v61 = vld [vmem:[#allocation17_spill] sm:$0xff] }
 0x2f6   : > { %9476 = vmatprep.subr.bf16.mxu0 %v10805_v34  ;;  %9500 = vmatprep.subr.bf16.mxu1 %v10805_v34 }
 0x2f7   : > { %8743 = vmatprep.mubr.f32.mxu0 %v10323_v17  ;;  %8803 = vmatprep.mubr.f32.mxu1 %v10507_v55 }
 0x2f8   : > { %8744 = vmatmul.mubr.f32.vlgmr.msra.gmra.mrb[12].mxu0 %v10348_v26  ;;  %8804 = vmatmul.mubr.f32.vlgmr.msra.gmra.mrb[10].mxu1 %v10520_v2 }
 0x2f9   : > { %9478 = vmatpush3.bf16.msra.mxu0 %v10805_v34  ;;  %9502 = vmatpush3.bf16.msra.mxu1 %v10805_v34 }
 0x2fa   : > { %9480 = vmatprep.subr.bf16.mxu0 %v10803_v52  ;;  %9504 = vmatprep.subr.bf16.mxu1 %v10803_v52 }
 0x2fb   : > { %8746 = vmatprep.mubr.f32.mxu0 %v10354_v29  ;;  %8806 = vmatprep.mubr.f32.mxu1 %v10527_v6 }
 0x2fc   : > { %8747 = vmatmul.mubr.f32.gmra.mrb[14].mxu0 %v10362_v32  ;;  %8807 = vmatmul.mubr.f32.gmra.mrb[12].mxu1 %v10535_v14 }
 0x2fd   : > { %8753 = vmatprep.mubr.f32.mxu0 %v10326_v16  ;;  %8813 = vmatprep.mubr.f32.mxu1 %v10525_v4  ;;  %v11460_v4 = vld [vmem:[#allocation15_spill] sm:$0xff] }
 0x300   : > { %8754 = vmatmul.mubr.f32.vlgmr.msra.gmra.mrb[12].mxu0 %v10360_v31  ;;  %8814 = vmatmul.mubr.f32.vlgmr.msra.gmra.mrb[10].mxu1 %v10533_v12  ;;  %v11455_v12 = vld [vmem:[#allocation33_spill] sm:$0xff] }
 0x301   : > { %9482 = vmatpush3.bf16.msra.mxu0 %v10803_v52  ;;  %9506 = vmatpush3.bf16.msra.mxu1 %v10803_v52 }
 0x302   : > { %9484 = vmatprep.subr.bf16.mxu0 %v10811_v58  ;;  %9508 = vmatprep.subr.bf16.mxu1 %v10811_v58 }
 0x303   : > { %8756 = vmatprep.mubr.f32.mxu0 %v10366_v35  ;;  %8816 = vmatprep.mubr.f32.mxu1 %v10543_v21  ;;  %v10955_v21 = vsub.f32 %v7798_v30, %v5189_v27  ;;  %v11457_v27 = vld [vmem:[#allocation35_spill] sm:$0xff] }
 0x304   : > { %8757 = vmatmul.mubr.f32.gmra.mrb[14].mxu0 %v10381_v44  ;;  %8817 = vmatmul.mubr.f32.gmra.mrb[12].mxu1 %v10555_v25  ;;  %v10953_v25 = vsub.f32 %v7797_v59, %v5186_v50 }
 0x305   : > { %8763 = vmatprep.mubr.f32.mxu0 %v10330_v18  ;;  %8823 = vmatprep.mubr.f32.mxu1 %v11445_v53  ;;  %v11385_v50 = vand.u32 4294901760, %v10955_v21 }
 0x308   : > { %8764 = vmatmul.mubr.f32.vlgmr.msra.gmra.mrb[12].mxu0 %v11446_v57  ;;  %8824 = vmatmul.mubr.f32.vlgmr.msra.gmra.mrb[10].mxu1 %v11447_v1  ;;  %v11454_v1 = vand.u32 4294901760, %v10913_v49 }
 0x309   : > { %9486 = vmatpush3.bf16.msra.mxu0 %v10811_v58  ;;  %9510 = vmatpush3.bf16.msra.mxu1 %v10811_v58 }
 0x30a   : > { %9488 = vmatprep.subr.bf16.mxu0 %v10803_v52  ;;  %9512 = vmatprep.subr.bf16.mxu1 %v10803_v52  ;;  %v5285_v53 = vsub.f32 %v10913_v49, %v11454_v1  ;;  %v5299_v1 = vsub.f32 %v10931_v63, %v11380_v23 }
 0x30b   : > { %8766 = vmatprep.mubr.f32.mxu0 %v11448_v62  ;;  %8826 = vmatprep.mubr.f32.mxu1 %v11449_v60  ;;  %v5278_v60 = vsub.f32 %v10911_v43, %v11379_v40 }
 0x30c   : > { %8767 = vmatmul.mubr.f32.gmra.mrb[14].mxu0 %v11450_v33  ;;  %8827 = vmatmul.mubr.f32.gmra.mrb[12].mxu1 %v11451_v28  ;;  %v11452_v28 = vld [vmem:[#allocation32_spill] sm:$0xff]  ;;  %v5286_v30 = vand.u32 4294901760, %v5285_v53  ;;  %v5313_v53 = vsub.f32 %v10955_v21, %v11385_v50  ;;  %v11464_v50 = vld [vmem:[#allocation21_spill] sm:$0xff] }
 0x30d   : > { %8773 = vmatprep.mubr.f32.mxu0 %v10323_v17  ;;  %8833 = vmatprep.mubr.f32.mxu1 %v10507_v55  ;;  %v5279_v59 = vand.u32 4294901760, %v5278_v60  ;;  %v11459_v60 = vld [vmem:[#allocation19_spill] sm:$0xff] }
 0x30f   : > { %v9559_v40 = vpack.c.bf16 %v5286_v30, %v5279_v59  ;;  %v5314_v30 = vand.u32 4294901760, %v5313_v53  ;;  %v11470_v53 = vld [vmem:[#allocation9_spill] sm:$0xff] }
 0x310   : > { %8774 = vmatmul.mubr.f32.vlgmr.msra.gmra.mrb[12].mxu0 %v10348_v26  ;;  %8834 = vmatmul.mubr.f32.vlgmr.msra.gmra.mrb[10].mxu1 %v10520_v2 }
 0x311   : > { %9490 = vmatpush3.bf16.msra.mxu0 %v10803_v52  ;;  %9514 = vmatpush3.bf16.msra.mxu1 %v10803_v52 }
 0x312   : > { %9516 = vmatprep.subr.bf16.mxu0 %v10803_v52  ;;  %8776 = vmatprep.mubr.f32.mxu0 %v10354_v29 }
 0x313   : > { %8836 = vmatprep.mubr.f32.mxu1 %v10527_v6  ;;  %9540 = vmatprep.subr.bf16.mxu1 %v10871_v45 }
 0x314   : > { %8777 = vmatmul.mubr.f32.gmra.mrb[14].mxu0 %v10362_v32  ;;  %8837 = vmatmul.mubr.f32.gmra.mrb[12].mxu1 %v10535_v14 }
 0x315   : > { %8783 = vmatprep.mubr.f32.mxu0 %v10323_v17  ;;  %8843 = vmatprep.mubr.f32.mxu1 %v10507_v55  ;;  %v11482_v55 = vand.u32 4294901760, %v10929_v0 }
 0x318   : > { %8784 = vmatmul.mubr.f32.vlgmr.msra.gmra.mrb[12].mxu0 %v10348_v26  ;;  %8844 = vmatmul.mubr.f32.vlgmr.msra.gmra.mrb[10].mxu1 %v10520_v2 }
 0x319   : > { %9518 = vmatpush3.bf16.msra.mxu0 %v10803_v52  ;;  %9542 = vmatpush3.bf16.msra.mxu1 %v10871_v45 }
 0x31a   : > { %9520 = vmatprep.subr.bf16.mxu0 %v10817_v9  ;;  %8786 = vmatprep.mubr.f32.mxu0 %v10354_v29 }
 0x31b   : > { %8846 = vmatprep.mubr.f32.mxu1 %v10527_v6  ;;  %9544 = vmatprep.subr.bf16.mxu1 %v10909_v15  ;;  %v11465_v6 = vld [vmem:[#allocation24_spill] sm:$0xff] }
 0x31c   : > { %8787 = vmatmul.mubr.f32.gmra.mrb[14].mxu0 %v10362_v32  ;;  %8847 = vmatmul.mubr.f32.gmra.mrb[12].mxu1 %v10535_v14  ;;  %v11463_v14 = vld [vmem:[#allocation25_spill] sm:$0xff] }
 0x31d   : > { %9546 = vmatpush3.bf16.msra.mxu1 %v10909_v15  ;;  %8853 = vmatprep.mubr.f32.mxu0 %v11452_v28 }
 0x31e   : > { %9548 = vmatprep.subr.bf16.mxu1 %v10919_v54  ;;  %8925 = vmatprep.mubr.f32.mxu1 %v11453_v8  ;;  %v5292_v8 = vsub.f32 %v10929_v0, %v11378_v56  ;;  %v5300_v56 = vand.u32 4294901760, %v5299_v1 }
 0x320   : > { %8854 = vmatmul.mubr.f32.vlgmr.msra.gmra.mrb[16].mxu0 %v11455_v12  ;;  %v5293_v7 = vand.u32 4294901760, %v5292_v8  ;;  %v11461_v8 = vld [vmem:[#allocation23_spill] sm:$0xff] }
 0x321   : > { %9522 = vmatpush3.bf16.msra.mxu0 %v10817_v9  ;;  %9550 = vmatpush3.bf16.msra.mxu1 %v10919_v54  ;;  %v11382_v9 = vand.u32 4294901760, %v10953_v25 }
 0x322   : > { %9524 = vmatprep.subr.bf16.mxu0 %v10805_v34  ;;  %8856 = vmatprep.mubr.f32.mxu0 %v11456_v42  ;;  %v9563_v1 = vpack.c.bf16 %v5300_v56, %v5293_v7  ;;  %v11467_v56 = vld [vmem:[#allocation29_spill] sm:$0xff]  ;;  %v11469_v7 = vld [vmem:[#allocation28_spill] sm:$0xff] }
 0x323   : > { %9552 = vmatprep.subr.bf16.mxu1 %v10941_v51  ;;  %v5306_v23 = vsub.f32 %v10953_v25, %v11382_v9  ;;  %v11462_v9 = vld [vmem:[#allocation8_spill] sm:$0xff] }
 0x324   : > { %8857 = vmatmul.mubr.f32.gmra.mrb[18].mxu0 %v11457_v27 }
 0x325   : > { %9554 = vmatpush3.bf16.msra.mxu1 %v10941_v51  ;;  %8863 = vmatprep.mubr.f32.mxu0 %v11458_v61  ;;  %v5307_v59 = vand.u32 4294901760, %v5306_v23  ;;  %v9571_v23 = vpack.c.bf16 %v10893_v47, %v10883_v48 }
 0x326   : > { %9556 = vmatprep.subr.bf16.mxu1 %v9555_v38 }
 0x328   : > { %8864 = vmatmul.mubr.f32.vlgmr.msra.gmra.mrb[16].mxu0 %v11459_v60  ;;  %8926 = vmatmul.mubr.f32.vlgmr.msra.gmra.mrb[14].mxu1 %v11460_v4  ;;  %v9567_v4 = vpack.c.bf16 %v5314_v30, %v5307_v59  ;;  %v9579_v59 = vpack.c.bf16 %v10931_v63, %v10929_v0  ;;  %v11472_v30 = vld [vmem:[#allocation10_spill] sm:$0xff] }
 0x329   : > { %9526 = vmatpush3.bf16.msra.mxu0 %v10805_v34  ;;  %9558 = vmatpush3.bf16.msra.mxu1 %v9555_v38  ;;  %v11466_v34 = vld [vmem:[#allocation27_spill] sm:$0xff]  ;;  %v9575_v38 = vpack.c.bf16 %v10913_v49, %v10911_v43 }
 0x32a   : > { %9528 = vmatprep.subr.bf16.mxu0 %v10803_v52  ;;  %8866 = vmatprep.mubr.f32.mxu0 %v11461_v8 }
 0x32b   : > { %9560 = vmatprep.subr.bf16.mxu1 %v9559_v40  ;;  %8944 = vmatprep.mubr.f32.mxu1 %v11462_v9 }
 0x32c   : > { %8867 = vmatmul.mubr.f32.gmra.mrb[18].mxu0 %v11463_v14 }
 0x32d   : > { %9562 = vmatpush3.bf16.msra.mxu1 %v9559_v40  ;;  %8873 = vmatprep.mubr.f32.mxu0 %v11464_v50  ;;  %v11468_v40 = vld [vmem:[#allocation26_spill] sm:$0xff] }
 0x32e   : > { %9564 = vmatprep.subr.bf16.mxu1 %v9563_v1 }
 0x330   : > { %8874 = vmatmul.mubr.f32.vlgmr.msra.gmra.mrb[16].mxu0 %v11465_v6 }
 0x331   : > { %9530 = vmatpush3.bf16.msra.mxu0 %v10803_v52  ;;  %9566 = vmatpush3.bf16.msra.mxu1 %v9563_v1  ;;  %v11471_v1 = vld [vmem:[#allocation30_spill] sm:$0xff] }
 0x332   : > { %9532 = vmatprep.subr.bf16.mxu0 %v10811_v58  ;;  %8876 = vmatprep.mubr.f32.mxu0 %v11466_v34 }
 0x333   : > { %9568 = vmatprep.subr.bf16.mxu1 %v9567_v4 }
 0x334   : > { %8877 = vmatmul.mubr.f32.gmra.mrb[18].mxu0 %v11467_v56 }
 0x335   : > { %9570 = vmatpush3.bf16.msra.mxu1 %v9567_v4  ;;  %8883 = vmatprep.mubr.f32.mxu0 %v11468_v40  ;;  %v11473_v4 = vld [vmem:[#allocation31_spill] sm:$0xff] }
 0x336   : > { %9572 = vmatprep.subr.bf16.mxu1 %v9571_v23 }
 0x338   : > { %8884 = vmatmul.mubr.f32.vlgmr.msra.gmra.mrb[16].mxu0 %v11469_v7  ;;  %8945 = vmatmul.mubr.f32.vlgmr.msra.gmra.mrb[14].mxu1 %v11470_v53 }
 0x339   : > { %9534 = vmatpush3.bf16.msra.mxu0 %v10811_v58  ;;  %9574 = vmatpush3.bf16.msra.mxu1 %v9571_v23  ;;  %v9583_v58 = vpack.c.bf16 %v10955_v21, %v10953_v25  ;;  %v11474_v23 = vld [vmem:[#allocation11_spill] sm:$0xff] }
 0x33a   : > { %9536 = vmatprep.subr.bf16.mxu0 %v10803_v52  ;;  %8886 = vmatprep.mubr.f32.mxu0 %v11471_v1 }
 0x33b   : > { %9576 = vmatprep.subr.bf16.mxu1 %v9575_v38  ;;  %8963 = vmatprep.mubr.f32.mxu1 %v11472_v30  ;;  %v11478_v30 = vand.u32 4294901760, %v10893_v47 }
 0x33c   : > { %8887 = vmatmul.mubr.f32.gmra.mrb[18].mxu0 %v11473_v4 }
 0x33d   : > { %9578 = vmatpush3.bf16.msra.mxu1 %v9575_v38  ;;  %8893 = vmatprep.mubr.f32.mxu0 %v11458_v61  ;;  %v11476_v38 = vld [vmem:[#allocation16_spill] sm:$0xff] }
 0x33e   : > { %9580 = vmatprep.subr.bf16.mxu1 %v9579_v59 }
 0x340   : > { %8894 = vmatmul.mubr.f32.vlgmr.msra.gmra.mrb[16].mxu0 %v11459_v60 }
 0x341   : > { %9538 = vmatpush3.bf16.msra.mxu0 %v10803_v52  ;;  %9582 = vmatpush3.bf16.msra.mxu1 %v9579_v59  ;;  %v11475_v52 = vld [vmem:[#allocation12_spill] sm:$0xff]  ;;  %v11477_v59 = vand.u32 4294901760, %v10883_v48  ;;  %v11483_v48 = vand.u32 4294901760, %v10931_v63 }
 0x342   : > { %8896 = vmatprep.mubr.f32.mxu0 %v11461_v8  ;;  %9584 = vmatprep.subr.bf16.mxu1 %v9583_v58 }
 0x343   : > { %v9611_v47 = vpack.c.bf16 %v11483_v48, %v11482_v55  ;;  %v7785_v55 = vld [vmem:[%s11309_s3 + $0x1] ss:$0 sm:$0xff] }
 0x344   : > { %8897 = vmatmul.mubr.f32.gmra.mrb[18].mxu0 %v11463_v14 }
 0x345   : > { %9586 = vmatpush3.bf16.msra.mxu1 %v9583_v58  ;;  %8903 = vmatprep.mubr.f32.mxu0 %v11458_v61  ;;  %v9603_v58 = vpack.c.bf16 %v11478_v30, %v11477_v59  ;;  %v11484_v59 = vand.u32 4294901760, %v10953_v25 }
 0x346   : > { %9588 = vmatprep.subr.bf16.mxu1 %v10871_v45 }
 0x348   : > { %8904 = vmatmul.mubr.f32.vlgmr.msra.gmra.mrb[16].mxu0 %v11459_v60  ;;  %8964 = vmatmul.mubr.f32.vlgmr.msra.gmra.mrb[14].mxu1 %v11474_v23  ;;  %v11479_v23 = vand.u32 4294901760, %v10911_v43  ;;  %v11485_v43 = vand.u32 4294901760, %v10955_v21 }
 0x349   : > { %9590 = vmatpush3.bf16.msra.mxu1 %v10871_v45  ;;  %8906 = vmatprep.mubr.f32.mxu0 %v11461_v8 }
 0x34a   : > { %9592 = vmatprep.subr.bf16.mxu1 %v10909_v15  ;;  %8982 = vmatprep.mubr.f32.mxu1 %v11475_v52  ;;  %v11480_v52 = vand.u32 4294901760, %v10913_v49  ;;  %v9615_v30 = vpack.c.bf16 %v11485_v43, %v11484_v59 }
 0x34c   : > { %8907 = vmatmul.mubr.f32.gmra.mrb[18].mxu0 %v11463_v14  ;;  %v9607_v2 = vpack.c.bf16 %v11480_v52, %v11479_v23 }
 0x34d   : > { %9594 = vmatpush3.bf16.msra.mxu1 %v10909_v15  ;;  %9027 = vmatprep.mubr.f32.mxu0 %v11476_v38  ;;  %v11481_v38 = vld [vmem:[#allocation13_spill] sm:$0xff] }
 0x34e   : > { %9596 = vmatprep.subr.bf16.mxu1 %v10919_v54 }
 0x351   : > { %9598 = vmatpush3.bf16.msra.mxu1 %v10919_v54 }
 0x352   : > { %9600 = vmatprep.subr.bf16.mxu1 %v10941_v51 }
 0x355   : > { %9602 = vmatpush3.bf16.msra.mxu1 %v10941_v51 }
 0x356   : > { %9604 = vmatprep.subr.bf16.mxu1 %v9603_v58 }
 0x358   : > { %8983 = vmatmul.mubr.f32.vlgmr.msra.gmra.mrb[14].mxu1 %v11481_v38 }
 0x359   : > { %9606 = vmatpush3.bf16.msra.mxu1 %v9603_v58  ;;  %9001 = vmatprep.mubr.f32.mxu1 %v11462_v9 }
 0x35a   : > { %9608 = vmatprep.subr.bf16.mxu1 %v9607_v2 }
 0x35d   : > { %9610 = vmatpush3.bf16.msra.mxu1 %v9607_v2  ;;  %v7786_v2 = vld [vmem:[%s11309_s3 + $0xa] ss:$0 sm:$0xff] }
 0x35e   : > { %9612 = vmatprep.subr.bf16.mxu1 %v9611_v47 }
 0x361   : > { %9614 = vmatpush3.bf16.msra.mxu1 %v9611_v47 }
 0x362   : > { %9616 = vmatprep.subr.bf16.mxu1 %v9615_v30 }
 0x365   : > { %9618 = vmatpush3.bf16.msra.mxu1 %v9615_v30 }
 0x366   : > { %9620 = vmatprep.subr.bf16.mxu1 %v10871_v45 }
 0x368   : > { %9002 = vmatmul.mubr.f32.vlgmr.msra.gmra.mrb[14].mxu1 %v11470_v53 }
 0x369   : > { %9622 = vmatpush3.bf16.msra.mxu1 %v10871_v45  ;;  %9020 = vmatprep.mubr.f32.mxu1 %v11462_v9  ;;  %v7787_v45 = vld [vmem:[%s11309_s3 + $0x4] ss:$0 sm:$0xff] }
 0x36a   : > { %9624 = vmatprep.subr.bf16.mxu1 %v10909_v15 }
 0x36d   : > { %9626 = vmatpush3.bf16.msra.mxu1 %v10909_v15  ;;  %v7788_v15 = vld [vmem:[%s11309_s3 + $0xd] ss:$0 sm:$0xff] }
 0x36e   : > { %9628 = vmatprep.subr.bf16.mxu1 %v10919_v54 }
 0x371   : > { %9630 = vmatpush3.bf16.msra.mxu1 %v10919_v54 }
 0x372   : > { %9632 = vmatprep.subr.bf16.mxu1 %v10941_v51 }
 0x375   : > { %9634 = vmatpush3.bf16.msra.mxu1 %v10941_v51 }
 0x378   : > { %9021 = vmatmul.mubr.f32.vlgmr.msra.gmra.mrb[14].mxu1 %v11470_v53 }
 0x379   : > { %9147 = vmatprep.mubr.f32.mxu1 %v11452_v28 }
 0x3eb   : > { %v8785_v21 = vpop.f32.mrb[12].mxu0  ;;  %v8845_v25 = vpop.f32.mrb[10].mxu1 }
 0x3ec   : > { %v3910_v49 = vmul.f32 %v8785_v21, %v7785_v55  ;;  %v3923_v28 = vmul.f32 %v8785_v21, %v7786_v2  ;;  %v3882_v54 = vpop.f32.mrb[13].mxu0  ;;  %v4496_v0 = vpop.f32.mrb[11].mxu1  ;;  %v4524_v58 = vmul.f32 %v8845_v25, %v7787_v45  ;;  %v4537_v23 = vmul.f32 %v8845_v25, %v7788_v15 }
 0x3ed   : > { %v3909_v63 = vmul.f32 %v7785_v55, %v3882_v54  ;;  %v3922_v51 = vmul.f32 %v7786_v2, %v3882_v54  ;;  %v4523_v48 = vmul.f32 %v7787_v45, %v4496_v0  ;;  %v4536_v47 = vmul.f32 %v7788_v15, %v4496_v0 }
 0x3ee   : > { %v3914_v9 = vadd.f32 %v3910_v49, %v10787_v46  ;;  %v3927_v53 = vadd.f32 %v3923_v28, %v10789_v20 }
 0x3ef   : > { %v3913_v52 = vadd.f32 %v3909_v63, %v10791_v19  ;;  %v3926_v38 = vadd.f32 %v3922_v51, %v10793_v3  ;;  %v8788_v59 = vpop.f32.mrb[14].mxu0  ;;  %v8848_v43 = vpop.f32.mrb[12].mxu1 }
 0x3f0   : > { %v4528_v30 = vadd.f32 %v4524_v58, %v3914_v9  ;;  %v4541_v21 = vadd.f32 %v4537_v23, %v3927_v53  ;;  %v3912_v11 = vmul.f32 %v8788_v59, %v7785_v55  ;;  %v3925_v10 = vmul.f32 %v8788_v59, %v7786_v2  ;;  %v3894_v22 = vpop.f32.mrb[15].mxu0  ;;  %v4508_v54 = vpop.f32.mrb[13].mxu1 }
 0x3f1   : > { %v4527_v4 = vadd.f32 %v4523_v48, %v3913_v52  ;;  %v4540_v46 = vadd.f32 %v4536_v47, %v3926_v38  ;;  %v4526_v49 = vmul.f32 %v8848_v43, %v7787_v45  ;;  %v4539_v20 = vmul.f32 %v8848_v43, %v7788_v15  ;;  %v7789_v52 = vld [vmem:[%s11309_s3 + $0x7] ss:$0 sm:$0xff] }
 0x3f2   : > { %v3916_v25 = vadd.f32 %v3912_v11, %v10795_v41  ;;  %v3929_v19 = vadd.f32 %v3925_v10, %v10797_v37  ;;  %v3911_v28 = vmul.f32 %v7785_v55, %v3894_v22  ;;  %v3924_v3 = vmul.f32 %v7786_v2, %v3894_v22  ;;  %v7790_v10 = vld [vmem:[%s11309_s3 + $0x10] ss:$0 sm:$0xff] }
 0x3f3   : > { %v4525_v63 = vmul.f32 %v7787_v45, %v4508_v54  ;;  %v4538_v0 = vmul.f32 %v7788_v15, %v4508_v54 }
 0x3f4   : > { %v4530_v51 = vadd.f32 %v4526_v49, %v3916_v25  ;;  %v4543_v33 = vadd.f32 %v4539_v20, %v3929_v19  ;;  %v3915_v9 = vadd.f32 %v3911_v28, %v10799_v39  ;;  %v3928_v53 = vadd.f32 %v3924_v3, %v10801_v36 }
 0x3f6   : > { %v4529_v58 = vadd.f32 %v4525_v63, %v3915_v9  ;;  %v4542_v23 = vadd.f32 %v4538_v0, %v3928_v53 }
 0x41b   : > { %v8905_v11 = vpop.f32.mrb[16].mxu0 }
 0x41c   : > { %v5138_v22 = vmul.f32 %v8905_v11, %v7789_v52  ;;  %v5151_v41 = vmul.f32 %v8905_v11, %v7790_v10  ;;  %v5110_v37 = vpop.f32.mrb[17].mxu0 }
 0x41d   : > { %v5137_v55 = vmul.f32 %v7789_v52, %v5110_v37  ;;  %v5150_v2 = vmul.f32 %v7790_v10, %v5110_v37 }
 0x41e   : > { %v11085_v45 = vadd.f32 %v5138_v22, %v4528_v30  ;;  %v11087_v39 = vadd.f32 %v5151_v41, %v4541_v21 }
 0x41f   : > { %v11089_v36 = vadd.f32 %v5137_v55, %v4527_v4  ;;  %v11091_v15 = vadd.f32 %v5150_v2, %v4540_v46  ;;  %v8908_v38 = vpop.f32.mrb[18].mxu0 }
 0x420   : > { %v5140_v48 = vmul.f32 %v8908_v38, %v7789_v52  ;;  %v5153_v47 = vmul.f32 %v8908_v38, %v7790_v10  ;;  %v5122_v59 = vpop.f32.mrb[19].mxu0 }
 0x421   : > { %v5139_v43 = vmul.f32 %v7789_v52, %v5122_v59  ;;  %v5152_v54 = vmul.f32 %v7790_v10, %v5122_v59 }
 0x422   : > { %v11093_v49 = vadd.f32 %v5140_v48, %v4530_v51  ;;  %v11095_v20 = vadd.f32 %v5153_v47, %v4543_v33 }
 0x423   : > { %v11097_v25 = vadd.f32 %v5139_v43, %v4529_v58  ;;  %v11099_v30 = vadd.f32 %v5152_v54, %v4542_v23 }
 0x44b   : > { %v9022_v21 = vpop.f32.mrb[14].mxu1 }
 0x44c   : > { %v5751_v19 = vand.u32 4294901760, %v9022_v21  ;;  %v5737_v4 = vpop.f32.mrb[15].mxu1 }
 0x44d   : > { %v5748_v28 = vand.u32 4294901760, %v5737_v4 }
 0x44e   : > { %v5863_v46 = vsub.f32 %v9022_v21, %v5751_v19 }
 0x44f   : > { %v11101_v3 = vpack.c.bf16 %v5751_v19, %v5748_v28  ;;  %v5856_v63 = vsub.f32 %v5737_v4, %v5748_v28  ;;  %v7803_v4 = vld [vmem:[%s11309_s3 + $0x8] ss:$0 sm:$0xff] }
 0x450   : > { %v5864_v0 = vand.u32 4294901760, %v5863_v46 }
 0x451   : > { %v5857_v9 = vand.u32 4294901760, %v5856_v63  ;;  %v11103_v53 = vpack.c.bf16 %v5863_v46, %v5856_v63  ;;  %9636 = vmatprep.subr.bf16.mxu0 %v11101_v3  ;;  %9684 = vmatprep.subr.bf16.mxu1 %v11101_v3 }
 0x452   : > { %v5865_v33 = vsub.f32 %v5863_v46, %v5864_v0  ;;  %9638 = vmatpush3.bf16.msra.mxu0 %v11101_v3  ;;  %9686 = vmatpush3.bf16.msra.mxu1 %v11101_v3 }
 0x453   : > { %v5858_v51 = vsub.f32 %v5856_v63, %v5857_v9  ;;  %v11109_v58 = vpack.c.bf16 %v5864_v0, %v5857_v9 }
 0x454   : > { %v5866_v23 = vand.u32 4294901760, %v5865_v33 }
 0x455   : > { %v5859_v52 = vand.u32 4294901760, %v5858_v51  ;;  %9028 = vmatmul.mubr.f32.vlgmr.msra.gmra.mrb[20].mxu0 %v10412_v5  ;;  %9148 = vmatmul.mubr.f32.vlgmr.msra.gmra.mrb[16].mxu1 %v11455_v12  ;;  %v11495_v5 = vld [vmem:[#allocation41_spill] sm:$0xff] }
 0x456   : > { %9030 = vmatprep.mubr.f32.mxu0 %v10429_v13  ;;  %9150 = vmatprep.mubr.f32.mxu1 %v11456_v42  ;;  %v11496_v13 = vld [vmem:[#allocation38_spill] sm:$0xff]  ;;  %v11499_v12 = vld [vmem:[#allocation45_spill] sm:$0xff]  ;;  %v11503_v42 = vld [vmem:[#allocation47_spill] sm:$0xff] }
 0x457   : > { %v11115_v10 = vpack.c.bf16 %v5866_v23, %v5859_v52 }
 0x459   : > { %9031 = vmatmul.mubr.f32.gmra.mrb[22].mxu0 %v10440_v24  ;;  %9640 = vmatprep.subr.bf16.mxu0 %v11115_v10  ;;  %v11497_v24 = vld [vmem:[#allocation40_spill] sm:$0xff] }
 0x45a   : > { %9151 = vmatmul.mubr.f32.gmra.mrb[18].mxu1 %v11457_v27  ;;  %9688 = vmatprep.subr.bf16.mxu1 %v11115_v10  ;;  %v7800_v27 = vld [vmem:[%s11309_s3 + $0xb] ss:$0 sm:$0xff] }
 0x45b   : > { %9642 = vmatpush3.bf16.msra.mxu0 %v11115_v10  ;;  %9690 = vmatpush3.bf16.msra.mxu1 %v11115_v10 }
 0x45c   : > { %9644 = vmatprep.subr.bf16.mxu0 %v11103_v53  ;;  %9692 = vmatprep.subr.bf16.mxu1 %v11103_v53 }
 0x45d   : > { %9037 = vmatprep.mubr.f32.mxu0 %v10323_v17  ;;  %9157 = vmatprep.mubr.f32.mxu1 %v11458_v61 }
 0x45e   : > { %9038 = vmatmul.mubr.f32.vlgmr.msra.gmra.mrb[20].mxu0 %v10348_v26  ;;  %9158 = vmatmul.mubr.f32.vlgmr.msra.gmra.mrb[16].mxu1 %v11459_v60 }
 0x45f   : > { %9646 = vmatpush3.bf16.msra.mxu0 %v11103_v53  ;;  %9694 = vmatpush3.bf16.msra.mxu1 %v11103_v53 }
 0x460   : > { %9648 = vmatprep.subr.bf16.mxu0 %v11101_v3  ;;  %9696 = vmatprep.subr.bf16.mxu1 %v11101_v3 }
 0x461   : > { %9040 = vmatprep.mubr.f32.mxu0 %v10354_v29  ;;  %9160 = vmatprep.mubr.f32.mxu1 %v11461_v8 }
 0x462   : > { %9041 = vmatmul.mubr.f32.gmra.mrb[22].mxu0 %v10362_v32  ;;  %9161 = vmatmul.mubr.f32.gmra.mrb[18].mxu1 %v11463_v14 }
 0x463   : > { %9047 = vmatprep.mubr.f32.mxu0 %v10326_v16  ;;  %9167 = vmatprep.mubr.f32.mxu1 %v11464_v50  ;;  %v11486_v16 = vld [vmem:[#allocation22_spill] sm:$0xff]  ;;  %v7799_v50 = vld [vmem:[%s11309_s3 + $0x2] ss:$0 sm:$0xff] }
 0x466   : > { %9048 = vmatmul.mubr.f32.vlgmr.msra.gmra.mrb[20].mxu0 %v10360_v31  ;;  %9168 = vmatmul.mubr.f32.vlgmr.msra.gmra.mrb[16].mxu1 %v11465_v6  ;;  %v11488_v31 = vld [vmem:[#allocation48_spill] sm:$0xff]  ;;  %v11498_v6 = vld [vmem:[#allocation43_spill] sm:$0xff] }
 0x467   : > { %9650 = vmatpush3.bf16.msra.mxu0 %v11101_v3  ;;  %9698 = vmatpush3.bf16.msra.mxu1 %v11101_v3 }
 0x468   : > { %9652 = vmatprep.subr.bf16.mxu0 %v11109_v58  ;;  %9700 = vmatprep.subr.bf16.mxu1 %v11109_v58 }
 0x469   : > { %9050 = vmatprep.mubr.f32.mxu0 %v10366_v35  ;;  %9170 = vmatprep.mubr.f32.mxu1 %v11466_v34  ;;  %v11491_v35 = vld [vmem:[#allocation51_spill] sm:$0xff] }
 0x46a   : > { %9051 = vmatmul.mubr.f32.gmra.mrb[22].mxu0 %v10381_v44  ;;  %9171 = vmatmul.mubr.f32.gmra.mrb[18].mxu1 %v11467_v56  ;;  %v11493_v44 = vld [vmem:[#allocation37_spill] sm:$0xff] }
 0x46b   : > { %9057 = vmatprep.mubr.f32.mxu0 %v10330_v18  ;;  %9177 = vmatprep.mubr.f32.mxu1 %v11468_v40  ;;  %v11487_v18 = vld [vmem:[#allocation31_spill] sm:$0xff] }
 0x46e   : > { %9058 = vmatmul.mubr.f32.vlgmr.msra.gmra.mrb[20].mxu0 %v11446_v57  ;;  %9178 = vmatmul.mubr.f32.vlgmr.msra.gmra.mrb[16].mxu1 %v11469_v7  ;;  %v11501_v57 = vld [vmem:[#allocation44_spill] sm:$0xff] }
 0x46f   : > { %9654 = vmatpush3.bf16.msra.mxu0 %v11109_v58  ;;  %9702 = vmatpush3.bf16.msra.mxu1 %v11109_v58 }
 0x470   : > { %9656 = vmatprep.subr.bf16.mxu0 %v11101_v3  ;;  %9704 = vmatprep.subr.bf16.mxu1 %v11101_v3 }
 0x471   : > { %9060 = vmatprep.mubr.f32.mxu0 %v11448_v62  ;;  %9180 = vmatprep.mubr.f32.mxu1 %v11471_v1  ;;  %v11502_v62 = vld [vmem:[#allocation46_spill] sm:$0xff] }
 0x472   : > { %9061 = vmatmul.mubr.f32.gmra.mrb[22].mxu0 %v11486_v16  ;;  %9181 = vmatmul.mubr.f32.gmra.mrb[18].mxu1 %v11487_v18 }
 0x473   : > { %9067 = vmatprep.mubr.f32.mxu0 %v10323_v17  ;;  %9187 = vmatprep.mubr.f32.mxu1 %v11458_v61 }
 0x476   : > { %9068 = vmatmul.mubr.f32.vlgmr.msra.gmra.mrb[20].mxu0 %v10348_v26  ;;  %9188 = vmatmul.mubr.f32.vlgmr.msra.gmra.mrb[16].mxu1 %v11459_v60 }
 0x477   : > { %9658 = vmatpush3.bf16.msra.mxu0 %v11101_v3  ;;  %9706 = vmatpush3.bf16.msra.mxu1 %v11101_v3 }
 0x478   : > { %9660 = vmatprep.subr.bf16.mxu0 %v11101_v3  ;;  %9070 = vmatprep.mubr.f32.mxu0 %v10354_v29 }
 0x479   : > { %9190 = vmatprep.mubr.f32.mxu1 %v11461_v8 }
 0x47a   : > { %9071 = vmatmul.mubr.f32.gmra.mrb[22].mxu0 %v10362_v32  ;;  %9191 = vmatmul.mubr.f32.gmra.mrb[18].mxu1 %v11463_v14 }
 0x47b   : > { %9077 = vmatprep.mubr.f32.mxu0 %v10323_v17  ;;  %9197 = vmatprep.mubr.f32.mxu1 %v11458_v61  ;;  %v11489_v17 = vld [vmem:[#allocation49_spill] sm:$0xff] }
 0x47e   : > { %9078 = vmatmul.mubr.f32.vlgmr.msra.gmra.mrb[20].mxu0 %v10348_v26  ;;  %9198 = vmatmul.mubr.f32.vlgmr.msra.gmra.mrb[16].mxu1 %v11459_v60  ;;  %v11490_v26 = vld [vmem:[#allocation50_spill] sm:$0xff] }
 0x47f   : > { %9662 = vmatpush3.bf16.msra.mxu0 %v11101_v3  ;;  %9080 = vmatprep.mubr.f32.mxu0 %v10354_v29  ;;  %v11492_v29 = vld [vmem:[#allocation36_spill] sm:$0xff] }
 0x480   : > { %9664 = vmatprep.subr.bf16.mxu0 %v11115_v10  ;;  %9200 = vmatprep.mubr.f32.mxu1 %v11461_v8 }
 0x482   : > { %9081 = vmatmul.mubr.f32.gmra.mrb[22].mxu0 %v10362_v32  ;;  %9201 = vmatmul.mubr.f32.gmra.mrb[18].mxu1 %v11463_v14  ;;  %v11494_v32 = vld [vmem:[#allocation39_spill] sm:$0xff]  ;;  %v11500_v14 = vld [vmem:[#allocation42_spill] sm:$0xff] }
 0x483   : > { %9087 = vmatprep.mubr.f32.mxu0 %v11488_v31 }
 0x486   : > { %9088 = vmatmul.mubr.f32.vlgmr.msra.gmra.mrb[24].mxu0 %v11489_v17 }
 0x487   : > { %9666 = vmatpush3.bf16.msra.mxu0 %v11115_v10  ;;  %9090 = vmatprep.mubr.f32.mxu0 %v11490_v26 }
 0x488   : > { %9668 = vmatprep.subr.bf16.mxu0 %v11103_v53 }
 0x48a   : > { %9091 = vmatmul.mubr.f32.gmra.mrb[26].mxu0 %v11491_v35 }
 0x48b   : > { %9097 = vmatprep.mubr.f32.mxu0 %v11492_v29 }
 0x48e   : > { %9098 = vmatmul.mubr.f32.vlgmr.msra.gmra.mrb[24].mxu0 %v11493_v44 }
 0x48f   : > { %9670 = vmatpush3.bf16.msra.mxu0 %v11103_v53  ;;  %9100 = vmatprep.mubr.f32.mxu0 %v11494_v32 }
 0x490   : > { %9672 = vmatprep.subr.bf16.mxu0 %v11101_v3 }
 0x492   : > { %9101 = vmatmul.mubr.f32.gmra.mrb[26].mxu0 %v11495_v5 }
 0x493   : > { %9107 = vmatprep.mubr.f32.mxu0 %v11496_v13 }
 0x496   : > { %9108 = vmatmul.mubr.f32.vlgmr.msra.gmra.mrb[24].mxu0 %v11497_v24 }
 0x497   : > { %9674 = vmatpush3.bf16.msra.mxu0 %v11101_v3  ;;  %9110 = vmatprep.mubr.f32.mxu0 %v11498_v6 }
 0x498   : > { %9676 = vmatprep.subr.bf16.mxu0 %v11109_v58 }
 0x49a   : > { %9111 = vmatmul.mubr.f32.gmra.mrb[26].mxu0 %v11499_v12 }
 0x49b   : > { %9117 = vmatprep.mubr.f32.mxu0 %v11500_v14 }
 0x49e   : > { %9118 = vmatmul.mubr.f32.vlgmr.msra.gmra.mrb[24].mxu0 %v11501_v57 }
 0x49f   : > { %9678 = vmatpush3.bf16.msra.mxu0 %v11109_v58  ;;  %9120 = vmatprep.mubr.f32.mxu0 %v11502_v62 }
 0x4a0   : > { %9680 = vmatprep.subr.bf16.mxu0 %v11101_v3 }
 0x4a2   : > { %9121 = vmatmul.mubr.f32.gmra.mrb[26].mxu0 %v11503_v42 }
 0x4a3   : > { %9127 = vmatprep.mubr.f32.mxu0 %v11492_v29 }
 0x4a6   : > { %9128 = vmatmul.mubr.f32.vlgmr.msra.gmra.mrb[24].mxu0 %v11493_v44 }
 0x4a7   : > { %9682 = vmatpush3.bf16.msra.mxu0 %v11101_v3  ;;  %9130 = vmatprep.mubr.f32.mxu0 %v11494_v32 }
 0x4aa   : > { %9131 = vmatmul.mubr.f32.gmra.mrb[26].mxu0 %v11495_v5 }
 0x4ab   : > { %9137 = vmatprep.mubr.f32.mxu0 %v11492_v29 }
 0x4ae   : > { %9138 = vmatmul.mubr.f32.vlgmr.msra.gmra.mrb[24].mxu0 %v11493_v44 }
 0x4af   : > { %9140 = vmatprep.mubr.f32.mxu0 %v11494_v32 }
 0x4b2   : > { %9141 = vmatmul.mubr.f32.gmra.mrb[26].mxu0 %v11495_v5 }
 0x551   : > { %v9079_v61 = vpop.f32.mrb[20].mxu0  ;;  %v9199_v60 = vpop.f32.mrb[16].mxu1 }
 0x552   : > { %v6341_v8 = vmul.f32 %v9079_v61, %v7799_v50  ;;  %v6354_v34 = vmul.f32 %v9079_v61, %v7800_v27  ;;  %v6313_v56 = vpop.f32.mrb[21].mxu0  ;;  %v7541_v40 = vpop.f32.mrb[17].mxu1  ;;  %v7569_v46 = vmul.f32 %v9199_v60, %v7803_v4 }
 0x553   : > { %v6340_v7 = vmul.f32 %v7799_v50, %v6313_v56  ;;  %v6353_v1 = vmul.f32 %v7800_v27, %v6313_v56  ;;  %v7568_v9 = vmul.f32 %v7803_v4, %v7541_v40 }
 0x554   : > { %v6345_v11 = vadd.f32 %v6341_v8, %v11085_v45  ;;  %v6358_v22 = vadd.f32 %v6354_v34, %v11087_v39 }
 0x555   : > { %v6344_v41 = vadd.f32 %v6340_v7, %v11089_v36  ;;  %v6357_v37 = vadd.f32 %v6353_v1, %v11091_v15  ;;  %v9082_v55 = vpop.f32.mrb[22].mxu0  ;;  %v9202_v2 = vpop.f32.mrb[18].mxu1  ;;  %v7801_v36 = vld [vmem:[%s11309_s3 + $0x5] ss:$0 sm:$0xff]  ;;  %v7802_v15 = vld [vmem:[%s11309_s3 + $0xe] ss:$0 sm:$0xff] }
 0x556   : > { %v6343_v38 = vmul.f32 %v9082_v55, %v7799_v50  ;;  %v6356_v48 = vmul.f32 %v9082_v55, %v7800_v27  ;;  %v6325_v47 = vpop.f32.mrb[23].mxu0  ;;  %v7553_v59 = vpop.f32.mrb[19].mxu1  ;;  %v7571_v58 = vmul.f32 %v9202_v2, %v7803_v4 }
 0x557   : > { %v6342_v43 = vmul.f32 %v7799_v50, %v6325_v47  ;;  %v6355_v54 = vmul.f32 %v7800_v27, %v6325_v47  ;;  %v7570_v6 = vmul.f32 %v7803_v4, %v7553_v59  ;;  %v7614_v47 = vstv %s7613_s14 }
 0x558   : > { %v6347_v21 = vadd.f32 %v6343_v38, %v11093_v49  ;;  %v6360_v19 = vadd.f32 %v6356_v48, %v11095_v20  ;;  %v7804_v49 = vld [vmem:[%s11309_s3 + $0x11] ss:$0 sm:$0xff] }
 0x559   : > { %v6346_v45 = vadd.f32 %v6342_v43, %v11097_v25  ;;  %v6359_v39 = vadd.f32 %v6355_v54, %v11099_v30  ;;  %v7582_v0 = vmul.f32 %v9199_v60, %v7804_v49  ;;  %v7581_v51 = vmul.f32 %v7804_v49, %v7541_v40 }
 0x55a   : > { %v7584_v5 = vmul.f32 %v9202_v2, %v7804_v49  ;;  %v7583_v12 = vmul.f32 %v7804_v49, %v7553_v59 }
 0x581   : > { %v9139_v20 = vpop.f32.mrb[24].mxu0 }
 0x582   : > { %v6955_v25 = vmul.f32 %v9139_v20, %v7801_v36  ;;  %v6968_v28 = vmul.f32 %v9139_v20, %v7802_v15  ;;  %v6927_v30 = vpop.f32.mrb[25].mxu0 }
 0x583   : > { %v6954_v3 = vmul.f32 %v7801_v36, %v6927_v30  ;;  %v6967_v63 = vmul.f32 %v7802_v15, %v6927_v30 }
 0x584   : > { %v6972_v53 = vadd.f32 %v6968_v28, %v6358_v22  ;;  %v6959_v33 = vadd.f32 %v6955_v25, %v6345_v11 }
 0x585   : > { %v6958_v23 = vadd.f32 %v6954_v3, %v6344_v41  ;;  %v6971_v52 = vadd.f32 %v6967_v63, %v6357_v37  ;;  %v9142_v10 = vpop.f32.mrb[26].mxu0 }
 0x586   : > { %v6957_v16 = vmul.f32 %v9142_v10, %v7801_v36  ;;  %v6970_v18 = vmul.f32 %v9142_v10, %v7802_v15  ;;  %v6939_v31 = vpop.f32.mrb[27].mxu0  ;;  %v7586_v17 = vadd.f32 %v7582_v0, %v6972_v53  ;;  %v7573_v26 = vadd.f32 %v7569_v46, %v6959_v33 }
 0x587   : > { %v6956_v35 = vmul.f32 %v7801_v36, %v6939_v31  ;;  %v6969_v29 = vmul.f32 %v7802_v15, %v6939_v31  ;;  %v7572_v44 = vadd.f32 %v7568_v9, %v6958_v23  ;;  %v7585_v32 = vadd.f32 %v7581_v51, %v6971_v52 }
 0x588   : > { %v6961_v13 = vadd.f32 %v6957_v16, %v6347_v21  ;;  %v6974_v24 = vadd.f32 %v6970_v18, %v6360_v19  ;;  %7629 = vrot.lane.b32.xlu1 %v7586_v17, %s10055_s12  ;;  %7591 = vrot.lane.b32.xlu0 %v7573_v26, %s10055_s12  ;;  %v7652_v19 = vstv %s7805_s15 }
 0x589   : > { %v6960_v14 = vadd.f32 %v6956_v35, %v6346_v45  ;;  %v6973_v57 = vadd.f32 %v6969_v29, %v6359_v39 }
 0x58a   : > { %v7575_v62 = vadd.f32 %v7571_v58, %v6961_v13  ;;  %v7588_v42 = vadd.f32 %v7584_v5, %v6974_v24 }
 0x58b   : > { %v7574_v50 = vadd.f32 %v7570_v6, %v6960_v14  ;;  %v7587_v27 = vadd.f32 %v7583_v12, %v6973_v57 }
 0x58c   : > { %7589 = vrot.lane.b32.xlu0 %v7572_v44, %s10055_s12  ;;  %7595 = vrot.lane.b32.xlu1 %v7575_v62, %s10055_s12 }
 0x590   : > { %7627 = vrot.lane.b32.xlu0 %v7585_v32, %s10055_s12  ;;  %7593 = vrot.lane.b32.xlu1 %v7574_v50, %s10055_s12 }
 0x594   : > { %7631 = vrot.lane.b32.xlu0 %v7587_v27, %s10055_s12  ;;  %7633 = vrot.lane.b32.xlu1 %v7588_v42, %s10055_s12 }
 0x5fa   : > { %v7630_v61 = vpop.permute.xlu1 %7629  ;;  %v7592_v60 = vpop.permute.xlu0 %7591 }
 0x5fb   : > { %v7598_v8 = vadd.f32 %v7592_v60, %v7573_v26  ;;  %v7636_v40 = vadd.f32 %v7630_v61, %v7586_v17 }
 0x5fd   : > { %7603 = vrot.lane.b32.xlu1 %v7598_v8, %s10056_s13 }
 0x5fe   : > { %v7590_v34 = vpop.permute.xlu0 %7589  ;;  %v7596_v56 = vpop.permute.xlu1 %7595 }
 0x5ff   : > { %v7597_v7 = vadd.f32 %v7590_v34, %v7572_v44  ;;  %v7600_v22 = vadd.f32 %v7596_v56, %v7575_v62 }
 0x601   : > { %7601 = vrot.lane.b32.xlu0 %v7597_v7, %s10056_s13  ;;  %7641 = vrot.lane.b32.xlu1 %v7636_v40, %s10056_s13 }
 0x602   : > { %v7628_v1 = vpop.permute.xlu0 %7627  ;;  %v7594_v11 = vpop.permute.xlu1 %7593 }
 0x603   : > { %v7635_v41 = vadd.f32 %v7628_v1, %v7585_v32  ;;  %v7599_v55 = vadd.f32 %v7594_v11, %v7574_v50 }
 0x605   : > { %7639 = vrot.lane.b32.xlu0 %v7635_v41, %s10056_s13  ;;  %7607 = vrot.lane.b32.xlu1 %v7600_v22, %s10056_s13 }
 0x606   : > { %v7634_v37 = vpop.permute.xlu1 %7633  ;;  %v7632_v38 = vpop.permute.xlu0 %7631 }
 0x607   : > { %v7638_v2 = vadd.f32 %v7634_v37, %v7588_v42  ;;  %v7637_v48 = vadd.f32 %v7632_v38, %v7587_v27 }
 0x609   : > { %7605 = vrot.lane.b32.xlu0 %v7599_v55, %s10056_s13  ;;  %7645 = vrot.lane.b32.xlu1 %v7638_v2, %s10056_s13 }
 0x60d   : > { %7643 = vrot.lane.b32.xlu0 %v7637_v48, %s10056_s13 }
 0x66f   : > { %v7604_v59 = vpop.permute.xlu1 %7603 }
 0x670   : > { %v7610_v43 = vadd.f32 %v7604_v59, %v7598_v8 }
 0x672   : > { %v7616_v54 = vadd.f32 %v7614_v47, %v7610_v43 }
 0x673   : > { %v7602_v21 = vpop.permute.xlu0 %7601  ;;  %v7642_v45 = vpop.permute.xlu1 %7641 }
 0x674   : > { %v7620_v39 = vmax.f32 %v7616_v54, 0.0  ;;  %v7609_v36 = vadd.f32 %v7602_v21, %v7597_v7  ;;  %v7648_v15 = vadd.f32 %v7642_v45, %v7636_v40 }
 0x676   : > { %7624 = vst [vmem:[%s11244_s23 + $0x8] sm:$0xff] %v7620_v39  ;;  %v7615_v4 = vadd.f32 %v7614_v47, %v7609_v36  ;;  %v7654_v49 = vadd.f32 %v7652_v19, %v7648_v15 }
 0x677   : > { %v7640_v20 = vpop.permute.xlu0 %7639  ;;  %v7608_v25 = vpop.permute.xlu1 %7607 }
 0x678   : > { %v7619_v28 = vmax.f32 %v7615_v4, 0.0  ;;  %v7658_v30 = vmax.f32 %v7654_v49, 0.0  ;;  %v7647_v46 = vadd.f32 %v7640_v20, %v7635_v41  ;;  %v7612_v3 = vadd.f32 %v7608_v25, %v7600_v22 }
 0x67a   : > { %7623 = vst [vmem:[%s11244_s23] sm:$0xff] %v7619_v28  ;;  %7807 = vst [vmem:[%s11244_s23 + $0x28] sm:$0xff] %v7658_v30  ;;  %v7653_v63 = vadd.f32 %v7652_v19, %v7647_v46  ;;  %v7618_v0 = vadd.f32 %v7614_v47, %v7612_v3 }
 0x67b   : > { %v7606_v9 = vpop.permute.xlu0 %7605  ;;  %v7646_v53 = vpop.permute.xlu1 %7645 }
 0x67c   : > { %v7657_v33 = vmax.f32 %v7653_v63, 0.0  ;;  %v7622_v51 = vmax.f32 %v7618_v0, 0.0  ;;  %v7611_v58 = vadd.f32 %v7606_v9, %v7599_v55  ;;  %v7650_v23 = vadd.f32 %v7646_v53, %v7638_v2 }
 0x67e   : > { %7806 = vst [vmem:[%s11244_s23 + $0x20] sm:$0xff] %v7657_v33  ;;  %7626 = vst [vmem:[%s11244_s23 + $0x18] sm:$0xff] %v7622_v51  ;;  %v7617_v52 = vadd.f32 %v7614_v47, %v7611_v58  ;;  %v7656_v10 = vadd.f32 %v7652_v19, %v7650_v23 }
 0x67f   : > { %v7644_v16 = vpop.permute.xlu0 %7643 }
 0x680   : > { %v7621_v18 = vmax.f32 %v7617_v52, 0.0  ;;  %v7660_v31 = vmax.f32 %v7656_v10, 0.0  ;;  %v7649_v17 = vadd.f32 %v7644_v16, %v7637_v48 }
 0x682   : > { %7625 = vst [vmem:[%s11244_s23 + $0x10] sm:$0xff] %v7621_v18  ;;  %7809 = vst [vmem:[%s11244_s23 + $0x38] sm:$0xff] %v7660_v31  ;;  %v7655_v26 = vadd.f32 %v7652_v19, %v7649_v17 }
 0x684   : > { %v7659_v35 = vmax.f32 %v7655_v26, 0.0 }
 0x686   : > { %7808 = vst [vmem:[%s11244_s23 + $0x30] sm:$0xff] %v7659_v35 }
 0x687   : > { %9999 = shalt.err (!%p9996_p2)
}
 0x688   : > { %s10000_s12 = scalar_lea.hbm %s11258_s7, 1024  ;;  %s10004_s15 = scalar_lea.hbm %s11311_s5, 2048 }
 0x689   : > { %p10001_p3 = scmp.ne.s32.totalorder %s11258_s7, %s10000_s12  ;;  %p10005_p8 = scmp.lt.u32.totalorder %s11258_s7, %s11311_s5 }
 0x68a   : > { %p10006_p10 = scmp.lt.u32.totalorder %s10004_s15, %s10000_s12  ;;  %p10008_p11 = scmp.lt.u32.totalorder %s10000_s12, %s11258_s7 }
 0x68b   : > { %p10002_p4 = pnand %p10001_p3, %p10128_p5 }
 0x68c   : > { %p10007_p9 = por %p10006_p10, %p10005_p8 }
 0x68d   : > { %p10003_p7 = pneg %p10002_p4 }
 0x68e   : > { %p10009_p12 = por %p10008_p11, %p10007_p9 }
 0x690   : > { %p10010_p13 = pnand %p10009_p12, %p10003_p7 }
 0x692   : > { %10013 = shalt.err (!%p10010_p13)
}
 0x693   : > { %s10058_s23 = smov 128   ;;  %s10059_s25 = smov 8  }
 0x694   : > { %9921 = dma.vmem_to_hbm [thread:$0]  (%p10128_p5), %s11260_s26, 1024, %s11258_s7, %s11265_s8, %s10058_s23, %s10058_s23, %s10059_s25  }
 0x695 PF: > { %p9933_p0 = scmp.ge.s32.totalorder %s10052_s21, 2  ;;  %s7695_s30 = sand.u32 1, %s10040_s18  }
 0x696   : > { %s7696_s6 = scalar_lea.sflag [#allocation3], %s7695_s30 }
 0x697   : > { %p9928_p1 = pnand %p9933_p0, %p10132_p6 }
 0x699   : > { %10035 = dma.done.wait (!%p9928_p1), %s7696_s6, 1024  }
 0x69a   : > { %10037 = vsyncadd (!%p9928_p1), %s7696_s6, 4294966272  ;;  %p16_p2 = scmp.ge.s32.totalorder %s10115_s24, 4   ;;  %s11504_s18 = smov %s10044_s19 }
 0x69b   : > { %s11505_s19 = smov %s10048_s20  ;;  %s11506_s20 = smov %s10126_s27 }
 0x69c   : > { %s11507_s21 = smov %s10115_s24  ;;  %18 = sbr.rel (!%p16_p2) target bundleno = 4 (0x4), region = 85 }
 0x6a3   :  { %7701 = vsyncpa [#allocation3], 1 }
 0x6a4   :  { %7703 = vsyncpa [#allocation3 + $0x1], 1 }
 0x6a5   :  { %7704 = vsyncpa [#allocation4], 1 }
 0x6a6   :  { %7706 = vsyncpa [#allocation4 + $0x1], 1 }

</bundles_post_ra>
